<compile_context>
chip_gen: v5e
topology: v5e:2x2
jax: 0.10.0
libtpu: 0.0.40
codegen_flags: <defaults>
</compile_context>

<pallas_src>
import math

import jax
import jax.numpy as jnp
from jax.experimental import pallas as pl
from jax.experimental.pallas import tpu as pltpu


def _relu(x):
    return jnp.maximum(x, 0.0)


def e_gcl_at_kernel(
    h_ref, coord_ref, stft_ref,
    # q/k/v MLPs (Linear+ReLU+Linear+ReLU), weights stored (in, out), biases (1, out)
    qw1, qb1, qw2, qb2,
    kw1, kb1, kw2, kb2,
    vw1, vb1, vw2, vb2,
    # qs/ks/vs MLPs (bias-free)
    qsw1, qsw2, ksw1, ksw2, vsw1, vsw2,
    # coord_mlp: Linear(D,D)+b, ReLU, Linear(D,1,no bias, xavier gain 0.001)
    cw1, cb1, cw2,
    # coord_mlp_s: Linear(6,16)+b, ReLU, Linear(16,1)+b
    csw1, csb1, csw2, csb2,
    # gamma_mlp Linear(D+6,1)+b split into the h-part and the magnitude-part
    gwh, gws, gb,
    # outputs
    h_out, coord_out, stft_out,
):
    Bb, T, D = h_ref.shape
    C = coord_ref.shape[-1]
    F = stft_ref.shape[-1]

    h = h_ref[...]            # (Bb, T, D)
    coord = coord_ref[...]    # (Bb, T, C)
    stft = stft_ref[...]      # (Bb, C, T, F)

    # Flatten leading dims so every MLP is a single 2-D MXU matmul.
    h2 = h.reshape(Bb * T, D)
    stft2 = stft.reshape(Bb * C * T, F)

    def mlp2(x, w1, b1, w2, b2):
        y = _relu(jnp.dot(x, w1[...], preferred_element_type=jnp.float32) + b1[...])
        return _relu(jnp.dot(y, w2[...], preferred_element_type=jnp.float32) + b2[...])

    def mlp2_nb(x, w1, w2):
        y = _relu(jnp.dot(x, w1[...], preferred_element_type=jnp.float32))
        return _relu(jnp.dot(y, w2[...], preferred_element_type=jnp.float32))

    def softmax_last(x):
        # exp on EUP; divide replaced by EUP approx reciprocal (otherwise-idle slot).
        m = jnp.max(x, axis=-1, keepdims=True)
        e = jnp.exp(x - m)
        return e * pl.reciprocal(jnp.sum(e, axis=-1, keepdims=True), approx=True)

    q = mlp2(h2, qw1, qb1, qw2, qb2).reshape(Bb, T, D)
    k = mlp2(h2, kw1, kb1, kw2, kb2).reshape(Bb, T, D)
    v2 = mlp2(h2, vw1, vb1, vw2, vb2)               # keep 2-D for coord_mlp
    v = v2.reshape(Bb, T, D)

    # stft MLPs as flat 2-D dots, then a single merged (Bb*C) batch dim for attention.
    qs = mlp2_nb(stft2, qsw1, qsw2).reshape(Bb * C, T, F)
    ks = mlp2_nb(stft2, ksw1, ksw2).reshape(Bb * C, T, F)
    vs = mlp2_nb(stft2, vsw1, vsw2).reshape(Bb * C, T, F)

    # scores[b,i,j] = <q_i, k_j>;  scores_s[x,i,j] = <qs[x,i], ks[x,j]>
    scores = jnp.einsum('btd,bsd->bts', q, k,
                        preferred_element_type=jnp.float32)             # (Bb, T, T)
    scores_s = jnp.einsum('xtf,xsf->xts', qs, ks,
                          preferred_element_type=jnp.float32)           # (Bb*C, T, T)

    alpha = softmax_last(scores)                                        # (Bb, T, T)
    alpha_s = softmax_last(scores_s)                                    # (Bb*C, T, T)

    h_agg = jnp.einsum('bts,bsd->btd', alpha, v,
                       preferred_element_type=jnp.float32)              # (Bb, T, D)
    h_agg_s = jnp.einsum('xts,xsf->xtf', alpha_s, vs,
                         preferred_element_type=jnp.float32)            # (Bb*C, T, F)
    h_agg_s4 = h_agg_s.reshape(Bb, C, T, F)

    # torch: norm(h_agg_s.permute(0,3,2,1), dim=-1).permute(0,2,1) -> norm over C
    h_agg_s_mag = jnp.sqrt(jnp.sum(h_agg_s4 * h_agg_s4, axis=1))        # (Bb, T, F)

    # coord_mlp(v) -> per-source-timestep scalar (last Linear has no bias).
    cmlp_v = jnp.dot(
        _relu(jnp.dot(v2, cw1[...], preferred_element_type=jnp.float32) + cb1[...]),
        cw2[...], preferred_element_type=jnp.float32).reshape(Bb, T, 1)

    # x_agg[b,i] = sum_j alpha[b,i,j]*cmlp_v[b,j]*(coord[b,j]-coord[b,i])
    #            = (alpha @ (cmlp_v*coord))[b,i] - coord[b,i]*(alpha @ cmlp_v)[b,i]
    # (matmul form: no (T,T,C) intermediate, no cross-sublane reduce).
    w_coord = cmlp_v * coord                                            # (Bb, T, C)
    x_agg = (jnp.einsum('bts,bsc->btc', alpha, w_coord,
                        preferred_element_type=jnp.float32)
             - coord * jnp.einsum('bts,bsc->btc', alpha, cmlp_v,
                                  preferred_element_type=jnp.float32))  # (Bb, T, C)

    # vs magnitude over the coordinate axis -> (Bb, T, F); coord_mlp_s -> (Bb, T, 1)
    vs4 = vs.reshape(Bb, C, T, F)
    vs_mag = jnp.sqrt(jnp.sum(vs4 * vs4, axis=1))                       # (Bb, T, F)
    cmlps = (jnp.dot(
        _relu(jnp.dot(vs_mag.reshape(Bb * T, F), csw1[...],
                      preferred_element_type=jnp.float32) + csb1[...]),
        csw2[...], preferred_element_type=jnp.float32)
        + csb2[...]).reshape(Bb, T, 1)                                  # (Bb, T, 1)

    # torch: alpha_s_magnitude = norm(alpha_s.permute(0,3,2,1), dim=-1, keepdim=True)
    # (never permuted back) -> the factor used at (i, j) is ||alpha_s[b,:,j,i]||,
    # so contract over asm's FIRST T axis instead of materializing a transpose.
    alpha_s4 = alpha_s.reshape(Bb, C, T, T)
    asm = jnp.sqrt(jnp.sum(alpha_s4 * alpha_s4, axis=1))                # (Bb, T, T)
    ws_coord = cmlps * coord                                            # (Bb, T, C)
    x_agg_s = (jnp.einsum('bst,bsc->btc', asm, ws_coord,
                          preferred_element_type=jnp.float32)
               - coord * jnp.einsum('bst,bsc->btc', asm, cmlps,
                                    preferred_element_type=jnp.float32))

    # gamma = sigmoid(Linear(concat(h, h_agg_s_mag))) implemented as a split matmul
    glogit = (jnp.dot(h2, gwh[...], preferred_element_type=jnp.float32)
              + jnp.dot(h_agg_s_mag.reshape(Bb * T, F), gws[...],
                        preferred_element_type=jnp.float32)
              + gb[...]).reshape(Bb, T, 1)
    gamma = jax.nn.sigmoid(glogit)
    # TODO(synk): gamma_mean_per_128 / gamma_mean_all are computed in torch but
    # never used in the returned values, so they are omitted here.

    coord_out[...] = coord + gamma * x_agg + (1.0 - gamma) * x_agg_s
    h_out[...] = h + h_agg              # recurrent=True
    stft_out[...] = stft + h_agg_s4     # recurrent=True


def init_params(key, D, F=6):
    """Deterministic parameter init (uniform ~ PyTorch Linear default)."""
    keys = list(jax.random.split(key, 64))
    it = iter(keys)

    def lin(i, o, scale=None):
        s = (1.0 / math.sqrt(i)) if scale is None else scale
        return jax.random.uniform(next(it), (i, o), jnp.float32, -s, s)

    def bias(o, fan_in):
        s = 1.0 / math.sqrt(fan_in)
        return jax.random.uniform(next(it), (1, o), jnp.float32, -s, s)

    params = []
    # q_mlp, k_mlp, v_mlp
    for _ in range(3):
        params += [lin(D, D), bias(D, D), lin(D, D), bias(D, D)]
    # qs_mlp, ks_mlp, vs_mlp (bias-free)
    for _ in range(3):
        params += [lin(F, 16), lin(16, F)]
    # coord_mlp (last layer xavier gain 0.001 -> tiny scale)
    params += [lin(D, D), bias(D, D), lin(D, 1, scale=0.001)]
    # coord_mlp_s
    params += [lin(F, 16), bias(16, F), lin(16, 1), bias(1, 16)]
    # gamma_mlp: Linear(D+F, 1) split into (D,1) and (F,1) pieces + bias
    gw = lin(D + F, 1)
    params += [gw[:D], gw[D:], bias(1, D + F)]
    return params


def _pick_block_b(B, max_block=32):
    """Largest divisor of B (<= max_block) that still leaves >= 2 grid steps
    so both v7x TensorCores get work."""
    best = 1
    for cand in range(1, min(B, max_block) + 1):
        if B % cand == 0 and (B // cand) >= 2:
            best = cand
    return best


def e_gcl_at_forward(h, coord, stft, params, block_b=None):
    B, T, D = h.shape
    C = coord.shape[-1]
    F = stft.shape[-1]

    if block_b is None:
        block_b = _pick_block_b(B)
    assert B % block_b == 0, (B, block_b)
    grid = (B // block_b,)

    def batch_spec(shape):
        nd = len(shape)
        return pl.BlockSpec((block_b,) + tuple(shape[1:]),
                            lambda b, _nd=nd: (b,) + (0,) * (_nd - 1))

    # Weights/biases are grid-invariant: keep one resident VMEM copy
    # (no per-step pipelining / double-buffering).
    weight_spec = pl.BlockSpec(memory_space=pltpu.MemorySpace.VMEM)

    in_specs = [batch_spec(h.shape), batch_spec(coord.shape), batch_spec(stft.shape)]
    in_specs += [weight_spec] * len(params)
    out_specs = [batch_spec(h.shape), batch_spec(coord.shape), batch_spec(stft.shape)]
    out_shape = [jax.ShapeDtypeStruct(h.shape, h.dtype),
                 jax.ShapeDtypeStruct(coord.shape, coord.dtype),
                 jax.ShapeDtypeStruct(stft.shape, stft.dtype)]

    # Rough cost estimate (helps XLA schedule around the custom call).
    flops = B * (
        3 * 2 * 2 * T * D * D                 # q/k/v MLPs
        + 3 * 2 * 2 * C * T * F * 16          # qs/ks/vs MLPs
        + 2 * 2 * T * T * D                   # scores + h_agg
        + 2 * 2 * C * T * T * F               # scores_s + h_agg_s
        + 2 * T * D * D + 2 * T * D           # coord_mlp
        + 2 * T * F * 16 + 2 * T * 16         # coord_mlp_s
        + 2 * T * (D + F)                     # gamma
        + 4 * 2 * T * T * (C + 1))            # x_agg / x_agg_s matmuls
    transcendentals = B * (T * T + C * T * T + T)
    io_bytes = 4 * (2 * B * (T * D + T * C + C * T * F)
                    + sum(int(p.size) for p in params))

    # VMEM budget: weights (single copy) + double-buffered in/out blocks +
    # activation headroom; clamped to stay comfortably under v7x's 64 MiB.
    weight_bytes = sum(int(p.size) * 4 for p in params)
    block_bytes = 4 * block_b * (T * D + T * C + C * T * F)
    vmem_limit = int(min(48 * 2 ** 20,
                         max(16 * 2 ** 20, 4 * (weight_bytes + 4 * block_bytes))))

    fn = pl.pallas_call(
        e_gcl_at_kernel,
        grid=grid,
        in_specs=in_specs,
        out_specs=out_specs,
        out_shape=out_shape,
        compiler_params=pltpu.CompilerParams(
            dimension_semantics=("parallel",),
            vmem_limit_bytes=vmem_limit),
        cost_estimate=pl.CostEstimate(flops=flops,
                                      transcendentals=transcendentals,
                                      bytes_accessed=io_bytes),
    )
    return fn(h, coord, stft, *params)


def reference_forward(h, coord, stft, params):
    """Pure-JAX mirror of the torch E_GCL_AT.forward (defaults)."""
    (qw1, qb1, qw2, qb2, kw1, kb1, kw2, kb2, vw1, vb1, vw2, vb2,
     qsw1, qsw2, ksw1, ksw2, vsw1, vsw2,
     cw1, cb1, cw2, csw1, csb1, csw2, csb2, gwh, gws, gb) = params
    relu = lambda x: jnp.maximum(x, 0.0)
    mlp2 = lambda x, w1, b1, w2, b2: relu(relu(x @ w1 + b1) @ w2 + b2)
    mlp2_nb = lambda x, w1, w2: relu(relu(x @ w1) @ w2)

    q = mlp2(h, qw1, qb1, qw2, qb2)
    k = mlp2(h, kw1, kb1, kw2, kb2)
    v = mlp2(h, vw1, vb1, vw2, vb2)
    qs = mlp2_nb(stft, qsw1, qsw2)
    ks = mlp2_nb(stft, ksw1, ksw2)
    vs = mlp2_nb(stft, vsw1, vsw2)

    coord_diff = coord[:, None, :, :] - coord[:, :, None, :]    # [b,i,j]=c[j]-c[i]
    scores = jnp.einsum('btd,bsd->bts', q, k)
    scores_s = jnp.einsum('bctf,bcsf->bcts', qs, ks)
    alpha = jax.nn.softmax(scores, axis=-1)
    alpha_s = jax.nn.softmax(scores_s, axis=-1)
    h_agg = jnp.einsum('bts,bsd->btd', alpha, v)
    h_agg_s = jnp.einsum('bcts,bcsf->bctf', alpha_s, vs)
    h_agg_s_mag = jnp.sqrt(jnp.sum(h_agg_s ** 2, axis=1))

    cmlp_v = relu(v @ cw1 + cb1) @ cw2                           # (B,T,1)
    x_agg = jnp.sum(coord_diff * alpha[..., None] * cmlp_v[:, None, :, :], axis=2)

    vs_mag = jnp.sqrt(jnp.sum(vs ** 2, axis=1))
    cmlps = relu(vs_mag @ csw1 + csb1) @ csw2 + csb2             # (B,T,1)
    asm = jnp.sqrt(jnp.sum(alpha_s ** 2, axis=1))                # (B,T,T)
    x_agg_s = jnp.sum(coord_diff * jnp.swapaxes(asm, 1, 2)[..., None]
                      * cmlps[:, None, :, :], axis=2)

    gamma = jax.nn.sigmoid(h @ gwh + h_agg_s_mag @ gws + gb)
    coord_o = coord + gamma * x_agg + (1.0 - gamma) * x_agg_s
    return h + h_agg, coord_o, stft + h_agg_s


if __name__ == "__main__":
    B, T, D, C, F = 4, 8, 32, 3, 6   # (bs*n_node, num_past, hidden_nf, coord_dim, freq_bins)

    key = jax.random.PRNGKey(0)
    k1, k2, k3, kp = jax.random.split(key, 4)
    h = jax.random.normal(k1, (B, T, D), dtype=jnp.float32)
    coord = jax.random.normal(k2, (B, T, C), dtype=jnp.float32)
    stft = jax.random.normal(k3, (B, C, T, F), dtype=jnp.float32)

    params = init_params(kp, D, F)

    h_out, coord_out, stft_out = e_gcl_at_forward(h, coord, stft, params)
    jax.block_until_ready((h_out, coord_out, stft_out))

    assert h_out.shape == (B, T, D)
    assert coord_out.shape == (B, T, C)
    assert stft_out.shape == (B, C, T, F)

    # Numerical sanity check against a pure-JAX reference of the torch forward.
    with jax.default_matmul_precision("highest"):
        h_ref, coord_ref, stft_ref = reference_forward(h, coord, stft, params)
    for got, want, name in ((h_out, h_ref, "h"),
                            (coord_out, coord_ref, "coord"),
                            (stft_out, stft_ref, "stft")):
        err = float(jnp.max(jnp.abs(got - want)))
        assert err < 1e-2, f"{name} mismatch: max|diff|={err}"

    print("KERNEL_OK")
</pallas_src>

<mosaic_0001>
module attributes {stable_mosaic.version = 11 : i64} {
  func.func @e_gcl_at_kernel(%arg0: i32, %arg1: memref<2x8x32xf32, #tpu.memory_space<vmem>>, %arg2: memref<2x8x3xf32, #tpu.memory_space<vmem>>, %arg3: memref<2x3x8x6xf32, #tpu.memory_space<vmem>>, %arg4: memref<32x32xf32, #tpu.memory_space<vmem>>, %arg5: memref<1x32xf32, #tpu.memory_space<vmem>>, %arg6: memref<32x32xf32, #tpu.memory_space<vmem>>, %arg7: memref<1x32xf32, #tpu.memory_space<vmem>>, %arg8: memref<32x32xf32, #tpu.memory_space<vmem>>, %arg9: memref<1x32xf32, #tpu.memory_space<vmem>>, %arg10: memref<32x32xf32, #tpu.memory_space<vmem>>, %arg11: memref<1x32xf32, #tpu.memory_space<vmem>>, %arg12: memref<32x32xf32, #tpu.memory_space<vmem>>, %arg13: memref<1x32xf32, #tpu.memory_space<vmem>>, %arg14: memref<32x32xf32, #tpu.memory_space<vmem>>, %arg15: memref<1x32xf32, #tpu.memory_space<vmem>>, %arg16: memref<6x16xf32, #tpu.memory_space<vmem>>, %arg17: memref<16x6xf32, #tpu.memory_space<vmem>>, %arg18: memref<6x16xf32, #tpu.memory_space<vmem>>, %arg19: memref<16x6xf32, #tpu.memory_space<vmem>>, %arg20: memref<6x16xf32, #tpu.memory_space<vmem>>, %arg21: memref<16x6xf32, #tpu.memory_space<vmem>>, %arg22: memref<32x32xf32, #tpu.memory_space<vmem>>, %arg23: memref<1x32xf32, #tpu.memory_space<vmem>>, %arg24: memref<32x1xf32, #tpu.memory_space<vmem>>, %arg25: memref<6x16xf32, #tpu.memory_space<vmem>>, %arg26: memref<1x16xf32, #tpu.memory_space<vmem>>, %arg27: memref<16x1xf32, #tpu.memory_space<vmem>>, %arg28: memref<1x1xf32, #tpu.memory_space<vmem>>, %arg29: memref<32x1xf32, #tpu.memory_space<vmem>>, %arg30: memref<6x1xf32, #tpu.memory_space<vmem>>, %arg31: memref<1x1xf32, #tpu.memory_space<vmem>>, %arg32: memref<2x8x32xf32, #tpu.memory_space<vmem>>, %arg33: memref<2x8x3xf32, #tpu.memory_space<vmem>>, %arg34: memref<2x3x8x6xf32, #tpu.memory_space<vmem>>) attributes {dimension_semantics = [#tpu.dimension_semantics<parallel>], iteration_bounds = array<i64: 2>, scalar_prefetch = 0 : i64, scratch_operands = 0 : i64, tpu.core_type = #tpu.core_type<tc>, window_params = [{transform_indices = @transform_0, window_bounds = array<i64: 2, 8, 32>}, {transform_indices = @transform_1, window_bounds = array<i64: 2, 8, 3>}, {transform_indices = @transform_2, window_bounds = array<i64: 2, 3, 8, 6>}, {pipeline_mode = #tpu.pipeline_mode<synchronous>, transform_indices = @transform_3, window_bounds = array<i64: 32, 32>}, {pipeline_mode = #tpu.pipeline_mode<synchronous>, transform_indices = @transform_4, window_bounds = array<i64: 1, 32>}, {pipeline_mode = #tpu.pipeline_mode<synchronous>, transform_indices = @transform_5, window_bounds = array<i64: 32, 32>}, {pipeline_mode = #tpu.pipeline_mode<synchronous>, transform_indices = @transform_6, window_bounds = array<i64: 1, 32>}, {pipeline_mode = #tpu.pipeline_mode<synchronous>, transform_indices = @transform_7, window_bounds = array<i64: 32, 32>}, {pipeline_mode = #tpu.pipeline_mode<synchronous>, transform_indices = @transform_8, window_bounds = array<i64: 1, 32>}, {pipeline_mode = #tpu.pipeline_mode<synchronous>, transform_indices = @transform_9, window_bounds = array<i64: 32, 32>}, {pipeline_mode = #tpu.pipeline_mode<synchronous>, transform_indices = @transform_10, window_bounds = array<i64: 1, 32>}, {pipeline_mode = #tpu.pipeline_mode<synchronous>, transform_indices = @transform_11, window_bounds = array<i64: 32, 32>}, {pipeline_mode = #tpu.pipeline_mode<synchronous>, transform_indices = @transform_12, window_bounds = array<i64: 1, 32>}, {pipeline_mode = #tpu.pipeline_mode<synchronous>, transform_indices = @transform_13, window_bounds = array<i64: 32, 32>}, {pipeline_mode = #tpu.pipeline_mode<synchronous>, transform_indices = @transform_14, window_bounds = array<i64: 1, 32>}, {pipeline_mode = #tpu.pipeline_mode<synchronous>, transform_indices = @transform_15, window_bounds = array<i64: 6, 16>}, {pipeline_mode = #tpu.pipeline_mode<synchronous>, transform_indices = @transform_16, window_bounds = array<i64: 16, 6>}, {pipeline_mode = #tpu.pipeline_mode<synchronous>, transform_indices = @transform_17, window_bounds = array<i64: 6, 16>}, {pipeline_mode = #tpu.pipeline_mode<synchronous>, transform_indices = @transform_18, window_bounds = array<i64: 16, 6>}, {pipeline_mode = #tpu.pipeline_mode<synchronous>, transform_indices = @transform_19, window_bounds = array<i64: 6, 16>}, {pipeline_mode = #tpu.pipeline_mode<synchronous>, transform_indices = @transform_20, window_bounds = array<i64: 16, 6>}, {pipeline_mode = #tpu.pipeline_mode<synchronous>, transform_indices = @transform_21, window_bounds = array<i64: 32, 32>}, {pipeline_mode = #tpu.pipeline_mode<synchronous>, transform_indices = @transform_22, window_bounds = array<i64: 1, 32>}, {pipeline_mode = #tpu.pipeline_mode<synchronous>, transform_indices = @transform_23, window_bounds = array<i64: 32, 1>}, {pipeline_mode = #tpu.pipeline_mode<synchronous>, transform_indices = @transform_24, window_bounds = array<i64: 6, 16>}, {pipeline_mode = #tpu.pipeline_mode<synchronous>, transform_indices = @transform_25, window_bounds = array<i64: 1, 16>}, {pipeline_mode = #tpu.pipeline_mode<synchronous>, transform_indices = @transform_26, window_bounds = array<i64: 16, 1>}, {pipeline_mode = #tpu.pipeline_mode<synchronous>, transform_indices = @transform_27, window_bounds = array<i64: 1, 1>}, {pipeline_mode = #tpu.pipeline_mode<synchronous>, transform_indices = @transform_28, window_bounds = array<i64: 32, 1>}, {pipeline_mode = #tpu.pipeline_mode<synchronous>, transform_indices = @transform_29, window_bounds = array<i64: 6, 1>}, {pipeline_mode = #tpu.pipeline_mode<synchronous>, transform_indices = @transform_30, window_bounds = array<i64: 1, 1>}, {transform_indices = @transform_31, window_bounds = array<i64: 2, 8, 32>}, {transform_indices = @transform_32, window_bounds = array<i64: 2, 8, 3>}, {transform_indices = @transform_33, window_bounds = array<i64: 2, 3, 8, 6>}]} {
    %c0 = arith.constant 0 : index
    %c0_0 = arith.constant 0 : index
    %c0_1 = arith.constant 0 : index
    %0 = vector.load %arg1[%c0, %c0_0, %c0_1] : memref<2x8x32xf32, #tpu.memory_space<vmem>>, vector<2x8x32xf32>
    %c0_2 = arith.constant 0 : index
    %c0_3 = arith.constant 0 : index
    %c0_4 = arith.constant 0 : index
    %1 = vector.load %arg2[%c0_2, %c0_3, %c0_4] : memref<2x8x3xf32, #tpu.memory_space<vmem>>, vector<2x8x3xf32>
    %c0_5 = arith.constant 0 : index
    %c0_6 = arith.constant 0 : index
    %c0_7 = arith.constant 0 : index
    %c0_8 = arith.constant 0 : index
    %2 = vector.load %arg3[%c0_5, %c0_6, %c0_7, %c0_8] : memref<2x3x8x6xf32, #tpu.memory_space<vmem>>, vector<2x3x8x6xf32>
    %3 = vector.shape_cast %0 : vector<2x8x32xf32> to vector<16x32xf32>
    %4 = vector.shape_cast %2 : vector<2x3x8x6xf32> to vector<48x6xf32>
    %c0_9 = arith.constant 0 : index
    %c0_10 = arith.constant 0 : index
    %5 = vector.load %arg4[%c0_9, %c0_10] : memref<32x32xf32, #tpu.memory_space<vmem>>, vector<32x32xf32>
    %cst = arith.constant dense<0.000000e+00> : vector<16x32xf32>
    %6 = tpu.matmul %3, %5, %cst {dimension_numbers = #tpu.dot_dimension_numbers<[1], [0], [0], [1], [0, 0, 1, 1], [], []>} : vector<16x32xf32>, vector<32x32xf32>, vector<16x32xf32> -> vector<16x32xf32>
    %c0_11 = arith.constant 0 : index
    %c0_12 = arith.constant 0 : index
    %7 = vector.load %arg5[%c0_11, %c0_12] : memref<1x32xf32, #tpu.memory_space<vmem>>, vector<1x32xf32>
    %8 = vector.broadcast %7 : vector<1x32xf32> to vector<16x32xf32>
    %9 = arith.addf %6, %8 : vector<16x32xf32>
    %cst_13 = arith.constant 0.000000e+00 : f32
    %10 = vector.broadcast %cst_13 : f32 to vector<16x32xf32>
    %11 = arith.maximumf %9, %10 : vector<16x32xf32>
    %c0_14 = arith.constant 0 : index
    %c0_15 = arith.constant 0 : index
    %12 = vector.load %arg6[%c0_14, %c0_15] : memref<32x32xf32, #tpu.memory_space<vmem>>, vector<32x32xf32>
    %cst_16 = arith.constant dense<0.000000e+00> : vector<16x32xf32>
    %13 = tpu.matmul %11, %12, %cst_16 {dimension_numbers = #tpu.dot_dimension_numbers<[1], [0], [0], [1], [0, 0, 1, 1], [], []>} : vector<16x32xf32>, vector<32x32xf32>, vector<16x32xf32> -> vector<16x32xf32>
    %c0_17 = arith.constant 0 : index
    %c0_18 = arith.constant 0 : index
    %14 = vector.load %arg7[%c0_17, %c0_18] : memref<1x32xf32, #tpu.memory_space<vmem>>, vector<1x32xf32>
    %15 = vector.broadcast %14 : vector<1x32xf32> to vector<16x32xf32>
    %16 = arith.addf %13, %15 : vector<16x32xf32>
    %cst_19 = arith.constant 0.000000e+00 : f32
    %17 = vector.broadcast %cst_19 : f32 to vector<16x32xf32>
    %18 = arith.maximumf %16, %17 : vector<16x32xf32>
    %19 = vector.shape_cast %18 : vector<16x32xf32> to vector<2x8x32xf32>
    %c0_20 = arith.constant 0 : index
    %c0_21 = arith.constant 0 : index
    %20 = vector.load %arg8[%c0_20, %c0_21] : memref<32x32xf32, #tpu.memory_space<vmem>>, vector<32x32xf32>
    %cst_22 = arith.constant dense<0.000000e+00> : vector<16x32xf32>
    %21 = tpu.matmul %3, %20, %cst_22 {dimension_numbers = #tpu.dot_dimension_numbers<[1], [0], [0], [1], [0, 0, 1, 1], [], []>} : vector<16x32xf32>, vector<32x32xf32>, vector<16x32xf32> -> vector<16x32xf32>
    %c0_23 = arith.constant 0 : index
    %c0_24 = arith.constant 0 : index
    %22 = vector.load %arg9[%c0_23, %c0_24] : memref<1x32xf32, #tpu.memory_space<vmem>>, vector<1x32xf32>
    %23 = vector.broadcast %22 : vector<1x32xf32> to vector<16x32xf32>
    %24 = arith.addf %21, %23 : vector<16x32xf32>
    %cst_25 = arith.constant 0.000000e+00 : f32
    %25 = vector.broadcast %cst_25 : f32 to vector<16x32xf32>
    %26 = arith.maximumf %24, %25 : vector<16x32xf32>
    %c0_26 = arith.constant 0 : index
    %c0_27 = arith.constant 0 : index
    %27 = vector.load %arg10[%c0_26, %c0_27] : memref<32x32xf32, #tpu.memory_space<vmem>>, vector<32x32xf32>
    %cst_28 = arith.constant dense<0.000000e+00> : vector<16x32xf32>
    %28 = tpu.matmul %26, %27, %cst_28 {dimension_numbers = #tpu.dot_dimension_numbers<[1], [0], [0], [1], [0, 0, 1, 1], [], []>} : vector<16x32xf32>, vector<32x32xf32>, vector<16x32xf32> -> vector<16x32xf32>
    %c0_29 = arith.constant 0 : index
    %c0_30 = arith.constant 0 : index
    %29 = vector.load %arg11[%c0_29, %c0_30] : memref<1x32xf32, #tpu.memory_space<vmem>>, vector<1x32xf32>
    %30 = vector.broadcast %29 : vector<1x32xf32> to vector<16x32xf32>
    %31 = arith.addf %28, %30 : vector<16x32xf32>
    %cst_31 = arith.constant 0.000000e+00 : f32
    %32 = vector.broadcast %cst_31 : f32 to vector<16x32xf32>
    %33 = arith.maximumf %31, %32 : vector<16x32xf32>
    %34 = vector.shape_cast %33 : vector<16x32xf32> to vector<2x8x32xf32>
    %c0_32 = arith.constant 0 : index
    %c0_33 = arith.constant 0 : index
    %35 = vector.load %arg12[%c0_32, %c0_33] : memref<32x32xf32, #tpu.memory_space<vmem>>, vector<32x32xf32>
    %cst_34 = arith.constant dense<0.000000e+00> : vector<16x32xf32>
    %36 = tpu.matmul %3, %35, %cst_34 {dimension_numbers = #tpu.dot_dimension_numbers<[1], [0], [0], [1], [0, 0, 1, 1], [], []>} : vector<16x32xf32>, vector<32x32xf32>, vector<16x32xf32> -> vector<16x32xf32>
    %c0_35 = arith.constant 0 : index
    %c0_36 = arith.constant 0 : index
    %37 = vector.load %arg13[%c0_35, %c0_36] : memref<1x32xf32, #tpu.memory_space<vmem>>, vector<1x32xf32>
    %38 = vector.broadcast %37 : vector<1x32xf32> to vector<16x32xf32>
    %39 = arith.addf %36, %38 : vector<16x32xf32>
    %cst_37 = arith.constant 0.000000e+00 : f32
    %40 = vector.broadcast %cst_37 : f32 to vector<16x32xf32>
    %41 = arith.maximumf %39, %40 : vector<16x32xf32>
    %c0_38 = arith.constant 0 : index
    %c0_39 = arith.constant 0 : index
    %42 = vector.load %arg14[%c0_38, %c0_39] : memref<32x32xf32, #tpu.memory_space<vmem>>, vector<32x32xf32>
    %cst_40 = arith.constant dense<0.000000e+00> : vector<16x32xf32>
    %43 = tpu.matmul %41, %42, %cst_40 {dimension_numbers = #tpu.dot_dimension_numbers<[1], [0], [0], [1], [0, 0, 1, 1], [], []>} : vector<16x32xf32>, vector<32x32xf32>, vector<16x32xf32> -> vector<16x32xf32>
    %c0_41 = arith.constant 0 : index
    %c0_42 = arith.constant 0 : index
    %44 = vector.load %arg15[%c0_41, %c0_42] : memref<1x32xf32, #tpu.memory_space<vmem>>, vector<1x32xf32>
    %45 = vector.broadcast %44 : vector<1x32xf32> to vector<16x32xf32>
    %46 = arith.addf %43, %45 : vector<16x32xf32>
    %cst_43 = arith.constant 0.000000e+00 : f32
    %47 = vector.broadcast %cst_43 : f32 to vector<16x32xf32>
    %48 = arith.maximumf %46, %47 : vector<16x32xf32>
    %49 = vector.shape_cast %48 : vector<16x32xf32> to vector<2x8x32xf32>
    %c0_44 = arith.constant 0 : index
    %c0_45 = arith.constant 0 : index
    %50 = vector.load %arg16[%c0_44, %c0_45] : memref<6x16xf32, #tpu.memory_space<vmem>>, vector<6x16xf32>
    %cst_46 = arith.constant dense<0.000000e+00> : vector<48x16xf32>
    %51 = tpu.matmul %4, %50, %cst_46 {dimension_numbers = #tpu.dot_dimension_numbers<[1], [0], [0], [1], [0, 0, 1, 1], [], []>} : vector<48x6xf32>, vector<6x16xf32>, vector<48x16xf32> -> vector<48x16xf32>
    %cst_47 = arith.constant 0.000000e+00 : f32
    %52 = vector.broadcast %cst_47 : f32 to vector<48x16xf32>
    %53 = arith.maximumf %51, %52 : vector<48x16xf32>
    %c0_48 = arith.constant 0 : index
    %c0_49 = arith.constant 0 : index
    %54 = vector.load %arg17[%c0_48, %c0_49] : memref<16x6xf32, #tpu.memory_space<vmem>>, vector<16x6xf32>
    %cst_50 = arith.constant dense<0.000000e+00> : vector<48x6xf32>
    %55 = tpu.matmul %53, %54, %cst_50 {dimension_numbers = #tpu.dot_dimension_numbers<[1], [0], [0], [1], [0, 0, 1, 1], [], []>} : vector<48x16xf32>, vector<16x6xf32>, vector<48x6xf32> -> vector<48x6xf32>
    %cst_51 = arith.constant 0.000000e+00 : f32
    %56 = vector.broadcast %cst_51 : f32 to vector<48x6xf32>
    %57 = arith.maximumf %55, %56 : vector<48x6xf32>
    %58 = vector.shape_cast %57 : vector<48x6xf32> to vector<6x8x6xf32>
    %c0_52 = arith.constant 0 : index
    %c0_53 = arith.constant 0 : index
    %59 = vector.load %arg18[%c0_52, %c0_53] : memref<6x16xf32, #tpu.memory_space<vmem>>, vector<6x16xf32>
    %cst_54 = arith.constant dense<0.000000e+00> : vector<48x16xf32>
    %60 = tpu.matmul %4, %59, %cst_54 {dimension_numbers = #tpu.dot_dimension_numbers<[1], [0], [0], [1], [0, 0, 1, 1], [], []>} : vector<48x6xf32>, vector<6x16xf32>, vector<48x16xf32> -> vector<48x16xf32>
    %cst_55 = arith.constant 0.000000e+00 : f32
    %61 = vector.broadcast %cst_55 : f32 to vector<48x16xf32>
    %62 = arith.maximumf %60, %61 : vector<48x16xf32>
    %c0_56 = arith.constant 0 : index
    %c0_57 = arith.constant 0 : index
    %63 = vector.load %arg19[%c0_56, %c0_57] : memref<16x6xf32, #tpu.memory_space<vmem>>, vector<16x6xf32>
    %cst_58 = arith.constant dense<0.000000e+00> : vector<48x6xf32>
    %64 = tpu.matmul %62, %63, %cst_58 {dimension_numbers = #tpu.dot_dimension_numbers<[1], [0], [0], [1], [0, 0, 1, 1], [], []>} : vector<48x16xf32>, vector<16x6xf32>, vector<48x6xf32> -> vector<48x6xf32>
    %cst_59 = arith.constant 0.000000e+00 : f32
    %65 = vector.broadcast %cst_59 : f32 to vector<48x6xf32>
    %66 = arith.maximumf %64, %65 : vector<48x6xf32>
    %67 = vector.shape_cast %66 : vector<48x6xf32> to vector<6x8x6xf32>
    %c0_60 = arith.constant 0 : index
    %c0_61 = arith.constant 0 : index
    %68 = vector.load %arg20[%c0_60, %c0_61] : memref<6x16xf32, #tpu.memory_space<vmem>>, vector<6x16xf32>
    %cst_62 = arith.constant dense<0.000000e+00> : vector<48x16xf32>
    %69 = tpu.matmul %4, %68, %cst_62 {dimension_numbers = #tpu.dot_dimension_numbers<[1], [0], [0], [1], [0, 0, 1, 1], [], []>} : vector<48x6xf32>, vector<6x16xf32>, vector<48x16xf32> -> vector<48x16xf32>
    %cst_63 = arith.constant 0.000000e+00 : f32
    %70 = vector.broadcast %cst_63 : f32 to vector<48x16xf32>
    %71 = arith.maximumf %69, %70 : vector<48x16xf32>
    %c0_64 = arith.constant 0 : index
    %c0_65 = arith.constant 0 : index
    %72 = vector.load %arg21[%c0_64, %c0_65] : memref<16x6xf32, #tpu.memory_space<vmem>>, vector<16x6xf32>
    %cst_66 = arith.constant dense<0.000000e+00> : vector<48x6xf32>
    %73 = tpu.matmul %71, %72, %cst_66 {dimension_numbers = #tpu.dot_dimension_numbers<[1], [0], [0], [1], [0, 0, 1, 1], [], []>} : vector<48x16xf32>, vector<16x6xf32>, vector<48x6xf32> -> vector<48x6xf32>
    %cst_67 = arith.constant 0.000000e+00 : f32
    %74 = vector.broadcast %cst_67 : f32 to vector<48x6xf32>
    %75 = arith.maximumf %73, %74 : vector<48x6xf32>
    %76 = vector.shape_cast %75 : vector<48x6xf32> to vector<6x8x6xf32>
    "tpu.trace_start"() <{level = 10 : i32, message = "btd,bsd->bts"}> : () -> ()
    %cst_68 = arith.constant dense<0.000000e+00> : vector<2x8x8xf32>
    %77 = tpu.matmul %19, %34, %cst_68 {dimension_numbers = #tpu.dot_dimension_numbers<[2], [2], [1], [1], [0, 0, 0, 1, 1, 1], [0], [0]>} : vector<2x8x32xf32>, vector<2x8x32xf32>, vector<2x8x8xf32> -> vector<2x8x8xf32>
    "tpu.trace_stop"() : () -> ()
    "tpu.trace_start"() <{level = 10 : i32, message = "xtf,xsf->xts"}> : () -> ()
    %cst_69 = arith.constant dense<0.000000e+00> : vector<6x8x8xf32>
    %78 = tpu.matmul %58, %67, %cst_69 {dimension_numbers = #tpu.dot_dimension_numbers<[2], [2], [1], [1], [0, 0, 0, 1, 1, 1], [0], [0]>} : vector<6x8x6xf32>, vector<6x8x6xf32>, vector<6x8x8xf32> -> vector<6x8x8xf32>
    "tpu.trace_stop"() : () -> ()
    %cst_70 = arith.constant dense<0xFF800000> : vector<2x8xf32>
    %79 = vector.multi_reduction <maximumf>, %77, %cst_70 [2] : vector<2x8x8xf32> to vector<2x8xf32>
    %80 = vector.shape_cast %79 : vector<2x8xf32> to vector<2x8x1xf32>
    %81 = vector.broadcast %80 : vector<2x8x1xf32> to vector<2x8x8xf32>
    %82 = arith.subf %77, %81 : vector<2x8x8xf32>
    %83 = math.exp %82 : vector<2x8x8xf32>
    %cst_71 = arith.constant dense<0.000000e+00> : vector<2x8xf32>
    %84 = vector.multi_reduction <add>, %83, %cst_71 [2] : vector<2x8x8xf32> to vector<2x8xf32>
    %85 = vector.shape_cast %84 : vector<2x8xf32> to vector<2x8x1xf32>
    %86 = tpu.reciprocal %85 {approx = true} : vector<2x8x1xf32> -> vector<2x8x1xf32>
    %87 = vector.broadcast %86 : vector<2x8x1xf32> to vector<2x8x8xf32>
    %88 = arith.mulf %83, %87 : vector<2x8x8xf32>
    %cst_72 = arith.constant dense<0xFF800000> : vector<6x8xf32>
    %89 = vector.multi_reduction <maximumf>, %78, %cst_72 [2] : vector<6x8x8xf32> to vector<6x8xf32>
    %90 = vector.shape_cast %89 : vector<6x8xf32> to vector<6x8x1xf32>
    %91 = vector.broadcast %90 : vector<6x8x1xf32> to vector<6x8x8xf32>
    %92 = arith.subf %78, %91 : vector<6x8x8xf32>
    %93 = math.exp %92 : vector<6x8x8xf32>
    %cst_73 = arith.constant dense<0.000000e+00> : vector<6x8xf32>
    %94 = vector.multi_reduction <add>, %93, %cst_73 [2] : vector<6x8x8xf32> to vector<6x8xf32>
    %95 = vector.shape_cast %94 : vector<6x8xf32> to vector<6x8x1xf32>
    %96 = tpu.reciprocal %95 {approx = true} : vector<6x8x1xf32> -> vector<6x8x1xf32>
    %97 = vector.broadcast %96 : vector<6x8x1xf32> to vector<6x8x8xf32>
    %98 = arith.mulf %93, %97 : vector<6x8x8xf32>
    "tpu.trace_start"() <{level = 10 : i32, message = "bts,bsd->btd"}> : () -> ()
    %cst_74 = arith.constant dense<0.000000e+00> : vector<2x8x32xf32>
    %99 = tpu.matmul %88, %49, %cst_74 {dimension_numbers = #tpu.dot_dimension_numbers<[2], [1], [1], [2], [0, 0, 0, 1, 1, 2], [0], [0]>} : vector<2x8x8xf32>, vector<2x8x32xf32>, vector<2x8x32xf32> -> vector<2x8x32xf32>
    "tpu.trace_stop"() : () -> ()
    "tpu.trace_start"() <{level = 10 : i32, message = "xts,xsf->xtf"}> : () -> ()
    %cst_75 = arith.constant dense<0.000000e+00> : vector<6x8x6xf32>
    %100 = tpu.matmul %98, %76, %cst_75 {dimension_numbers = #tpu.dot_dimension_numbers<[2], [1], [1], [2], [0, 0, 0, 1, 1, 2], [0], [0]>} : vector<6x8x8xf32>, vector<6x8x6xf32>, vector<6x8x6xf32> -> vector<6x8x6xf32>
    "tpu.trace_stop"() : () -> ()
    %101 = vector.shape_cast %100 : vector<6x8x6xf32> to vector<2x3x8x6xf32>
    %102 = arith.mulf %101, %101 : vector<2x3x8x6xf32>
    %cst_76 = arith.constant dense<0.000000e+00> : vector<2x8x6xf32>
    %103 = vector.multi_reduction <add>, %102, %cst_76 [1] : vector<2x3x8x6xf32> to vector<2x8x6xf32>
    %104 = math.sqrt %103 : vector<2x8x6xf32>
    %c0_77 = arith.constant 0 : index
    %c0_78 = arith.constant 0 : index
    %105 = vector.load %arg22[%c0_77, %c0_78] : memref<32x32xf32, #tpu.memory_space<vmem>>, vector<32x32xf32>
    %cst_79 = arith.constant dense<0.000000e+00> : vector<16x32xf32>
    %106 = tpu.matmul %48, %105, %cst_79 {dimension_numbers = #tpu.dot_dimension_numbers<[1], [0], [0], [1], [0, 0, 1, 1], [], []>} : vector<16x32xf32>, vector<32x32xf32>, vector<16x32xf32> -> vector<16x32xf32>
    %c0_80 = arith.constant 0 : index
    %c0_81 = arith.constant 0 : index
    %107 = vector.load %arg23[%c0_80, %c0_81] : memref<1x32xf32, #tpu.memory_space<vmem>>, vector<1x32xf32>
    %108 = vector.broadcast %107 : vector<1x32xf32> to vector<16x32xf32>
    %109 = arith.addf %106, %108 : vector<16x32xf32>
    %cst_82 = arith.constant 0.000000e+00 : f32
    %110 = vector.broadcast %cst_82 : f32 to vector<16x32xf32>
    %111 = arith.maximumf %109, %110 : vector<16x32xf32>
    %c0_83 = arith.constant 0 : index
    %c0_84 = arith.constant 0 : index
    %112 = vector.load %arg24[%c0_83, %c0_84] : memref<32x1xf32, #tpu.memory_space<vmem>>, vector<32x1xf32>
    %cst_85 = arith.constant dense<0.000000e+00> : vector<16x1xf32>
    %113 = tpu.matmul %111, %112, %cst_85 {dimension_numbers = #tpu.dot_dimension_numbers<[1], [0], [0], [1], [0, 0, 1, 1], [], []>} : vector<16x32xf32>, vector<32x1xf32>, vector<16x1xf32> -> vector<16x1xf32>
    %114 = vector.shape_cast %113 : vector<16x1xf32> to vector<2x8x1xf32>
    %115 = vector.broadcast %114 : vector<2x8x1xf32> to vector<2x8x3xf32>
    %116 = arith.mulf %115, %1 : vector<2x8x3xf32>
    "tpu.trace_start"() <{level = 10 : i32, message = "bts,bsc->btc"}> : () -> ()
    %cst_86 = arith.constant dense<0.000000e+00> : vector<2x8x3xf32>
    %117 = tpu.matmul %88, %116, %cst_86 {dimension_numbers = #tpu.dot_dimension_numbers<[2], [1], [1], [2], [0, 0, 0, 1, 1, 2], [0], [0]>} : vector<2x8x8xf32>, vector<2x8x3xf32>, vector<2x8x3xf32> -> vector<2x8x3xf32>
    %cst_87 = arith.constant dense<0.000000e+00> : vector<2x8x1xf32>
    %118 = tpu.matmul %88, %114, %cst_87 {dimension_numbers = #tpu.dot_dimension_numbers<[2], [1], [1], [2], [0, 0, 0, 1, 1, 2], [0], [0]>} : vector<2x8x8xf32>, vector<2x8x1xf32>, vector<2x8x1xf32> -> vector<2x8x1xf32>
    "tpu.trace_stop"() : () -> ()
    %119 = vector.broadcast %118 : vector<2x8x1xf32> to vector<2x8x3xf32>
    %120 = arith.mulf %1, %119 : vector<2x8x3xf32>
    %121 = arith.subf %117, %120 : vector<2x8x3xf32>
    %122 = vector.shape_cast %76 : vector<6x8x6xf32> to vector<2x3x8x6xf32>
    %123 = arith.mulf %122, %122 : vector<2x3x8x6xf32>
    %cst_88 = arith.constant dense<0.000000e+00> : vector<2x8x6xf32>
    %124 = vector.multi_reduction <add>, %123, %cst_88 [1] : vector<2x3x8x6xf32> to vector<2x8x6xf32>
    %125 = math.sqrt %124 : vector<2x8x6xf32>
    %126 = vector.shape_cast %125 : vector<2x8x6xf32> to vector<16x6xf32>
    %c0_89 = arith.constant 0 : index
    %c0_90 = arith.constant 0 : index
    %127 = vector.load %arg25[%c0_89, %c0_90] : memref<6x16xf32, #tpu.memory_space<vmem>>, vector<6x16xf32>
    %cst_91 = arith.constant dense<0.000000e+00> : vector<16x16xf32>
    %128 = tpu.matmul %126, %127, %cst_91 {dimension_numbers = #tpu.dot_dimension_numbers<[1], [0], [0], [1], [0, 0, 1, 1], [], []>} : vector<16x6xf32>, vector<6x16xf32>, vector<16x16xf32> -> vector<16x16xf32>
    %c0_92 = arith.constant 0 : index
    %c0_93 = arith.constant 0 : index
    %129 = vector.load %arg26[%c0_92, %c0_93] : memref<1x16xf32, #tpu.memory_space<vmem>>, vector<1x16xf32>
    %130 = vector.broadcast %129 : vector<1x16xf32> to vector<16x16xf32>
    %131 = arith.addf %128, %130 : vector<16x16xf32>
    %cst_94 = arith.constant 0.000000e+00 : f32
    %132 = vector.broadcast %cst_94 : f32 to vector<16x16xf32>
    %133 = arith.maximumf %131, %132 : vector<16x16xf32>
    %c0_95 = arith.constant 0 : index
    %c0_96 = arith.constant 0 : index
    %134 = vector.load %arg27[%c0_95, %c0_96] : memref<16x1xf32, #tpu.memory_space<vmem>>, vector<16x1xf32>
    %cst_97 = arith.constant dense<0.000000e+00> : vector<16x1xf32>
    %135 = tpu.matmul %133, %134, %cst_97 {dimension_numbers = #tpu.dot_dimension_numbers<[1], [0], [0], [1], [0, 0, 1, 1], [], []>} : vector<16x16xf32>, vector<16x1xf32>, vector<16x1xf32> -> vector<16x1xf32>
    %c0_98 = arith.constant 0 : index
    %c0_99 = arith.constant 0 : index
    %136 = vector.load %arg28[%c0_98, %c0_99] : memref<1x1xf32, #tpu.memory_space<vmem>>, vector<1x1xf32>
    %137 = vector.broadcast %136 : vector<1x1xf32> to vector<16x1xf32>
    %138 = arith.addf %135, %137 : vector<16x1xf32>
    %139 = vector.shape_cast %138 : vector<16x1xf32> to vector<2x8x1xf32>
    %140 = vector.shape_cast %98 : vector<6x8x8xf32> to vector<2x3x8x8xf32>
    %141 = arith.mulf %140, %140 : vector<2x3x8x8xf32>
    %cst_100 = arith.constant dense<0.000000e+00> : vector<2x8x8xf32>
    %142 = vector.multi_reduction <add>, %141, %cst_100 [1] : vector<2x3x8x8xf32> to vector<2x8x8xf32>
    %143 = math.sqrt %142 : vector<2x8x8xf32>
    %144 = vector.broadcast %139 : vector<2x8x1xf32> to vector<2x8x3xf32>
    %145 = arith.mulf %144, %1 : vector<2x8x3xf32>
    "tpu.trace_start"() <{level = 10 : i32, message = "bst,bsc->btc"}> : () -> ()
    %cst_101 = arith.constant dense<0.000000e+00> : vector<2x8x3xf32>
    %146 = tpu.matmul %143, %145, %cst_101 {dimension_numbers = #tpu.dot_dimension_numbers<[1], [1], [2], [2], [0, 0, 0, 2, 1, 2], [0], [0]>} : vector<2x8x8xf32>, vector<2x8x3xf32>, vector<2x8x3xf32> -> vector<2x8x3xf32>
    %cst_102 = arith.constant dense<0.000000e+00> : vector<2x8x1xf32>
    %147 = tpu.matmul %143, %139, %cst_102 {dimension_numbers = #tpu.dot_dimension_numbers<[1], [1], [2], [2], [0, 0, 0, 2, 1, 2], [0], [0]>} : vector<2x8x8xf32>, vector<2x8x1xf32>, vector<2x8x1xf32> -> vector<2x8x1xf32>
    "tpu.trace_stop"() : () -> ()
    %148 = vector.broadcast %147 : vector<2x8x1xf32> to vector<2x8x3xf32>
    %149 = arith.mulf %1, %148 : vector<2x8x3xf32>
    %150 = arith.subf %146, %149 : vector<2x8x3xf32>
    %c0_103 = arith.constant 0 : index
    %c0_104 = arith.constant 0 : index
    %151 = vector.load %arg29[%c0_103, %c0_104] : memref<32x1xf32, #tpu.memory_space<vmem>>, vector<32x1xf32>
    %cst_105 = arith.constant dense<0.000000e+00> : vector<16x1xf32>
    %152 = tpu.matmul %3, %151, %cst_105 {dimension_numbers = #tpu.dot_dimension_numbers<[1], [0], [0], [1], [0, 0, 1, 1], [], []>} : vector<16x32xf32>, vector<32x1xf32>, vector<16x1xf32> -> vector<16x1xf32>
    %153 = vector.shape_cast %104 : vector<2x8x6xf32> to vector<16x6xf32>
    %c0_106 = arith.constant 0 : index
    %c0_107 = arith.constant 0 : index
    %154 = vector.load %arg30[%c0_106, %c0_107] : memref<6x1xf32, #tpu.memory_space<vmem>>, vector<6x1xf32>
    %cst_108 = arith.constant dense<0.000000e+00> : vector<16x1xf32>
    %155 = tpu.matmul %153, %154, %cst_108 {dimension_numbers = #tpu.dot_dimension_numbers<[1], [0], [0], [1], [0, 0, 1, 1], [], []>} : vector<16x6xf32>, vector<6x1xf32>, vector<16x1xf32> -> vector<16x1xf32>
    %156 = arith.addf %152, %155 : vector<16x1xf32>
    %c0_109 = arith.constant 0 : index
    %c0_110 = arith.constant 0 : index
    %157 = vector.load %arg31[%c0_109, %c0_110] : memref<1x1xf32, #tpu.memory_space<vmem>>, vector<1x1xf32>
    %158 = vector.broadcast %157 : vector<1x1xf32> to vector<16x1xf32>
    %159 = arith.addf %156, %158 : vector<16x1xf32>
    %160 = vector.shape_cast %159 : vector<16x1xf32> to vector<2x8x1xf32>
    %161 = arith.negf %160 : vector<2x8x1xf32>
    %162 = math.exp %161 : vector<2x8x1xf32>
    %cst_111 = arith.constant 1.000000e+00 : f32
    %163 = vector.broadcast %cst_111 : f32 to vector<2x8x1xf32>
    %164 = arith.addf %163, %162 : vector<2x8x1xf32>
    %165 = arith.divf %163, %164 : vector<2x8x1xf32>
    %166 = vector.broadcast %165 : vector<2x8x1xf32> to vector<2x8x3xf32>
    %167 = arith.mulf %166, %121 : vector<2x8x3xf32>
    %168 = arith.addf %1, %167 : vector<2x8x3xf32>
    %cst_112 = arith.constant 1.000000e+00 : f32
    %169 = vector.broadcast %cst_112 : f32 to vector<2x8x1xf32>
    %170 = arith.subf %169, %165 : vector<2x8x1xf32>
    %171 = vector.broadcast %170 : vector<2x8x1xf32> to vector<2x8x3xf32>
    %172 = arith.mulf %171, %150 : vector<2x8x3xf32>
    %173 = arith.addf %168, %172 : vector<2x8x3xf32>
    %c0_113 = arith.constant 0 : index
    %c0_114 = arith.constant 0 : index
    %c0_115 = arith.constant 0 : index
    %174 = vector.load %arg33[%c0_113, %c0_114, %c0_115] : memref<2x8x3xf32, #tpu.memory_space<vmem>>, vector<2x8x3xf32>
    tpu.vector_store %arg33[%c0_113, %c0_114, %c0_115], %173 {strides = array<i32>} : memref<2x8x3xf32, #tpu.memory_space<vmem>>, vector<2x8x3xf32>,
    %175 = arith.addf %0, %99 : vector<2x8x32xf32>
    %c0_116 = arith.constant 0 : index
    %c0_117 = arith.constant 0 : index
    %c0_118 = arith.constant 0 : index
    %176 = vector.load %arg32[%c0_116, %c0_117, %c0_118] : memref<2x8x32xf32, #tpu.memory_space<vmem>>, vector<2x8x32xf32>
    tpu.vector_store %arg32[%c0_116, %c0_117, %c0_118], %175 {strides = array<i32>} : memref<2x8x32xf32, #tpu.memory_space<vmem>>, vector<2x8x32xf32>,
    %177 = arith.addf %2, %101 : vector<2x3x8x6xf32>
    %c0_119 = arith.constant 0 : index
    %c0_120 = arith.constant 0 : index
    %c0_121 = arith.constant 0 : index
    %c0_122 = arith.constant 0 : index
    %178 = vector.load %arg34[%c0_119, %c0_120, %c0_121, %c0_122] : memref<2x3x8x6xf32, #tpu.memory_space<vmem>>, vector<2x3x8x6xf32>
    tpu.vector_store %arg34[%c0_119, %c0_120, %c0_121, %c0_122], %177 {strides = array<i32>} : memref<2x3x8x6xf32, #tpu.memory_space<vmem>>, vector<2x3x8x6xf32>,
    return
  }
  func.func @transform_0(%arg0: i32) -> (i32, i32, i32) {
    %c0_i32 = arith.constant 0 : i32
    %c0_i32_0 = arith.constant 0 : i32
    %c0_i32_1 = arith.constant 0 : i32
    return %arg0, %c0_i32, %c0_i32_0 : i32, i32, i32
  }
  func.func @transform_1(%arg0: i32) -> (i32, i32, i32) {
    %c0_i32 = arith.constant 0 : i32
    %c0_i32_0 = arith.constant 0 : i32
    %c0_i32_1 = arith.constant 0 : i32
    return %arg0, %c0_i32, %c0_i32_0 : i32, i32, i32
  }
  func.func @transform_2(%arg0: i32) -> (i32, i32, i32, i32) {
    %c0_i32 = arith.constant 0 : i32
    %c0_i32_0 = arith.constant 0 : i32
    %c0_i32_1 = arith.constant 0 : i32
    %c0_i32_2 = arith.constant 0 : i32
    return %arg0, %c0_i32, %c0_i32_0, %c0_i32_1 : i32, i32, i32, i32
  }
  func.func @transform_3(%arg0: i32) -> (i32, i32) {
    %c0_i32 = arith.constant 0 : i32
    %c0_i32_0 = arith.constant 0 : i32
    %c0_i32_1 = arith.constant 0 : i32
    return %c0_i32, %c0_i32_0 : i32, i32
  }
  func.func @transform_4(%arg0: i32) -> (i32, i32) {
    %c0_i32 = arith.constant 0 : i32
    %c0_i32_0 = arith.constant 0 : i32
    %c0_i32_1 = arith.constant 0 : i32
    return %c0_i32, %c0_i32_0 : i32, i32
  }
  func.func @transform_5(%arg0: i32) -> (i32, i32) {
    %c0_i32 = arith.constant 0 : i32
    %c0_i32_0 = arith.constant 0 : i32
    %c0_i32_1 = arith.constant 0 : i32
    return %c0_i32, %c0_i32_0 : i32, i32
  }
  func.func @transform_6(%arg0: i32) -> (i32, i32) {
    %c0_i32 = arith.constant 0 : i32
    %c0_i32_0 = arith.constant 0 : i32
    %c0_i32_1 = arith.constant 0 : i32
    return %c0_i32, %c0_i32_0 : i32, i32
  }
  func.func @transform_7(%arg0: i32) -> (i32, i32) {
    %c0_i32 = arith.constant 0 : i32
    %c0_i32_0 = arith.constant 0 : i32
    %c0_i32_1 = arith.constant 0 : i32
    return %c0_i32, %c0_i32_0 : i32, i32
  }
  func.func @transform_8(%arg0: i32) -> (i32, i32) {
    %c0_i32 = arith.constant 0 : i32
    %c0_i32_0 = arith.constant 0 : i32
    %c0_i32_1 = arith.constant 0 : i32
    return %c0_i32, %c0_i32_0 : i32, i32
  }
  func.func @transform_9(%arg0: i32) -> (i32, i32) {
    %c0_i32 = arith.constant 0 : i32
    %c0_i32_0 = arith.constant 0 : i32
    %c0_i32_1 = arith.constant 0 : i32
    return %c0_i32, %c0_i32_0 : i32, i32
  }
  func.func @transform_10(%arg0: i32) -> (i32, i32) {
    %c0_i32 = arith.constant 0 : i32
    %c0_i32_0 = arith.constant 0 : i32
    %c0_i32_1 = arith.constant 0 : i32
    return %c0_i32, %c0_i32_0 : i32, i32
  }
  func.func @transform_11(%arg0: i32) -> (i32, i32) {
    %c0_i32 = arith.constant 0 : i32
    %c0_i32_0 = arith.constant 0 : i32
    %c0_i32_1 = arith.constant 0 : i32
    return %c0_i32, %c0_i32_0 : i32, i32
  }
  func.func @transform_12(%arg0: i32) -> (i32, i32) {
    %c0_i32 = arith.constant 0 : i32
    %c0_i32_0 = arith.constant 0 : i32
    %c0_i32_1 = arith.constant 0 : i32
    return %c0_i32, %c0_i32_0 : i32, i32
  }
  func.func @transform_13(%arg0: i32) -> (i32, i32) {
    %c0_i32 = arith.constant 0 : i32
    %c0_i32_0 = arith.constant 0 : i32
    %c0_i32_1 = arith.constant 0 : i32
    return %c0_i32, %c0_i32_0 : i32, i32
  }
  func.func @transform_14(%arg0: i32) -> (i32, i32) {
    %c0_i32 = arith.constant 0 : i32
    %c0_i32_0 = arith.constant 0 : i32
    %c0_i32_1 = arith.constant 0 : i32
    return %c0_i32, %c0_i32_0 : i32, i32
  }
  func.func @transform_15(%arg0: i32) -> (i32, i32) {
    %c0_i32 = arith.constant 0 : i32
    %c0_i32_0 = arith.constant 0 : i32
    %c0_i32_1 = arith.constant 0 : i32
    return %c0_i32, %c0_i32_0 : i32, i32
  }
  func.func @transform_16(%arg0: i32) -> (i32, i32) {
    %c0_i32 = arith.constant 0 : i32
    %c0_i32_0 = arith.constant 0 : i32
    %c0_i32_1 = arith.constant 0 : i32
    return %c0_i32, %c0_i32_0 : i32, i32
  }
  func.func @transform_17(%arg0: i32) -> (i32, i32) {
    %c0_i32 = arith.constant 0 : i32
    %c0_i32_0 = arith.constant 0 : i32
    %c0_i32_1 = arith.constant 0 : i32
    return %c0_i32, %c0_i32_0 : i32, i32
  }
  func.func @transform_18(%arg0: i32) -> (i32, i32) {
    %c0_i32 = arith.constant 0 : i32
    %c0_i32_0 = arith.constant 0 : i32
    %c0_i32_1 = arith.constant 0 : i32
    return %c0_i32, %c0_i32_0 : i32, i32
  }
  func.func @transform_19(%arg0: i32) -> (i32, i32) {
    %c0_i32 = arith.constant 0 : i32
    %c0_i32_0 = arith.constant 0 : i32
    %c0_i32_1 = arith.constant 0 : i32
    return %c0_i32, %c0_i32_0 : i32, i32
  }
  func.func @transform_20(%arg0: i32) -> (i32, i32) {
    %c0_i32 = arith.constant 0 : i32
    %c0_i32_0 = arith.constant 0 : i32
    %c0_i32_1 = arith.constant 0 : i32
    return %c0_i32, %c0_i32_0 : i32, i32
  }
  func.func @transform_21(%arg0: i32) -> (i32, i32) {
    %c0_i32 = arith.constant 0 : i32
    %c0_i32_0 = arith.constant 0 : i32
    %c0_i32_1 = arith.constant 0 : i32
    return %c0_i32, %c0_i32_0 : i32, i32
  }
  func.func @transform_22(%arg0: i32) -> (i32, i32) {
    %c0_i32 = arith.constant 0 : i32
    %c0_i32_0 = arith.constant 0 : i32
    %c0_i32_1 = arith.constant 0 : i32
    return %c0_i32, %c0_i32_0 : i32, i32
  }
  func.func @transform_23(%arg0: i32) -> (i32, i32) {
    %c0_i32 = arith.constant 0 : i32
    %c0_i32_0 = arith.constant 0 : i32
    %c0_i32_1 = arith.constant 0 : i32
    return %c0_i32, %c0_i32_0 : i32, i32
  }
  func.func @transform_24(%arg0: i32) -> (i32, i32) {
    %c0_i32 = arith.constant 0 : i32
    %c0_i32_0 = arith.constant 0 : i32
    %c0_i32_1 = arith.constant 0 : i32
    return %c0_i32, %c0_i32_0 : i32, i32
  }
  func.func @transform_25(%arg0: i32) -> (i32, i32) {
    %c0_i32 = arith.constant 0 : i32
    %c0_i32_0 = arith.constant 0 : i32
    %c0_i32_1 = arith.constant 0 : i32
    return %c0_i32, %c0_i32_0 : i32, i32
  }
  func.func @transform_26(%arg0: i32) -> (i32, i32) {
    %c0_i32 = arith.constant 0 : i32
    %c0_i32_0 = arith.constant 0 : i32
    %c0_i32_1 = arith.constant 0 : i32
    return %c0_i32, %c0_i32_0 : i32, i32
  }
  func.func @transform_27(%arg0: i32) -> (i32, i32) {
    %c0_i32 = arith.constant 0 : i32
    %c0_i32_0 = arith.constant 0 : i32
    %c0_i32_1 = arith.constant 0 : i32
    return %c0_i32, %c0_i32_0 : i32, i32
  }
  func.func @transform_28(%arg0: i32) -> (i32, i32) {
    %c0_i32 = arith.constant 0 : i32
    %c0_i32_0 = arith.constant 0 : i32
    %c0_i32_1 = arith.constant 0 : i32
    return %c0_i32, %c0_i32_0 : i32, i32
  }
  func.func @transform_29(%arg0: i32) -> (i32, i32) {
    %c0_i32 = arith.constant 0 : i32
    %c0_i32_0 = arith.constant 0 : i32
    %c0_i32_1 = arith.constant 0 : i32
    return %c0_i32, %c0_i32_0 : i32, i32
  }
  func.func @transform_30(%arg0: i32) -> (i32, i32) {
    %c0_i32 = arith.constant 0 : i32
    %c0_i32_0 = arith.constant 0 : i32
    %c0_i32_1 = arith.constant 0 : i32
    return %c0_i32, %c0_i32_0 : i32, i32
  }
  func.func @transform_31(%arg0: i32) -> (i32, i32, i32) {
    %c0_i32 = arith.constant 0 : i32
    %c0_i32_0 = arith.constant 0 : i32
    %c0_i32_1 = arith.constant 0 : i32
    return %arg0, %c0_i32, %c0_i32_0 : i32, i32, i32
  }
  func.func @transform_32(%arg0: i32) -> (i32, i32, i32) {
    %c0_i32 = arith.constant 0 : i32
    %c0_i32_0 = arith.constant 0 : i32
    %c0_i32_1 = arith.constant 0 : i32
    return %arg0, %c0_i32, %c0_i32_0 : i32, i32, i32
  }
  func.func @transform_33(%arg0: i32) -> (i32, i32, i32, i32) {
    %c0_i32 = arith.constant 0 : i32
    %c0_i32_0 = arith.constant 0 : i32
    %c0_i32_1 = arith.constant 0 : i32
    %c0_i32_2 = arith.constant 0 : i32
    return %arg0, %c0_i32, %c0_i32_0, %c0_i32_1 : i32, i32, i32, i32
  }
}

</mosaic_0001>

<bundles_post_ra>
// kernel: tpu_custom_call.1
= control target key start
LH: loop header
LB: loop body
LE: loop exit
PB: predicated region body
PF: predicated region fallthrough
CT: control target
= control target key end

     0   :  { %s3944_s6 = smov 1   ;;  %s3945_s10 = smov 2   ;;  %s4800_s0 = inlined_call_operand.smem [shape: u32[34], index: -1, kind: input, shape index: {}] }
   0x1   :  { %s3996_s5 = sld [smem:[%s4800_s0]]   ;;  %s3946_s14 = smov 3  }
   0x2   :  { %s4001_s9 = sld [smem:[%s4800_s0 + %s3944_s6]]   ;;  %s3947_s18 = smov 4  }
   0x3   :  { %s4006_s13 = sld [smem:[%s4800_s0 + %s3945_s10]]   ;;  %s3948_s22 = smov 5  }
   0x4   :  { %s4011_s17 = sld [smem:[%s4800_s0 + %s3946_s14]]   ;;  %s3949_s26 = smov 6  }
   0x5   :  { %s4016_s21 = sld [smem:[%s4800_s0 + %s3947_s18]]   ;;  %s3950_s30 = smov 7  }
   0x6   :  { %s4021_s25 = sld [smem:[%s4800_s0 + %s3948_s22]]   ;;  %s3951_s4 = smov 8  }
   0x7   :  { %4829 = sst [smem:[#allocation25_spill]] %s3996_s5  ;;  %s3952_s10 = smov 9  }
   0x8   :  { %4830 = sst [smem:[#allocation26_spill]] %s4001_s9  ;;  %s3953_s15 = smov 10  }
   0x9   :  { %4831 = sst [smem:[#allocation27_spill]] %s4006_s13  ;;  %s3954_s20 = smov 11  }
   0xa   :  { %s4026_s29 = sld [smem:[%s4800_s0 + %s3949_s26]]   ;;  %s3955_s26 = smov 12  }
   0xb   :  { %s4031_s3 = sld [smem:[%s4800_s0 + %s3950_s30]]   ;;  %s3956_s1 = smov 13  }
   0xc   :  { %4832 = sst [smem:[#allocation28_spill]] %s4021_s25  ;;  %s3957_s7 = smov 14  }
   0xd   :  { %s4036_s8 = sld [smem:[%s4800_s0 + %s3951_s4]]   ;;  %s3959_s22 = smov 16  }
   0xe   :  { %s4041_s14 = sld [smem:[%s4800_s0 + %s3952_s10]]   ;;  %s3960_s28 = smov 17  }
   0xf   :  { %s4046_s19 = sld [smem:[%s4800_s0 + %s3953_s15]]   ;;  %s3958_s15 = smov 15  }
  0x10   :  { %s4051_s24 = sld [smem:[%s4800_s0 + %s3954_s20]]   ;;  %s3971_s23 = smov 28  }
  0x11   :  { %4833 = sst [smem:[#allocation29_spill]] %s4031_s3  ;;  %s3973_s10 = smov 31  }
  0x12   :  { %s4056_s30 = sld [smem:[%s4800_s0 + %s3955_s26]]   ;;  %s3974_s16 = smov 32  }
  0x13   :  { %4834 = sst [smem:[#allocation30_spill]] %s4036_s8 }
  0x14   :  { %4835 = sst [smem:[#allocation31_spill]] %s4041_s14 }
  0x15   :  { %s4061_s6 = sld [smem:[%s4800_s0 + %s3956_s1]]   ;;  %s3972_s1 = smov 29  }
  0x16   :  { %s4066_s12 = sld [smem:[%s4800_s0 + %s3957_s7]]   ;;  %s3961_s7 = smov 18  }
  0x17   :  { %s4071_s20 = sld [smem:[%s4800_s0 + %s3958_s15]]   ;;  %s3962_s15 = smov 19  }
  0x18   :  { %s4076_s27 = sld [smem:[%s4800_s0 + %s3959_s22]]   ;;  %s3963_s22 = smov 20  }
  0x19   :  { %s4081_s4 = sld [smem:[%s4800_s0 + %s3960_s28]]   ;;  %s3964_s28 = smov 21  }
  0x1a   :  { %s4086_s9 = sld [smem:[%s4800_s0 + %s3961_s7]]   ;;  %s3965_s7 = smov 22  }
  0x1b   :  { %4836 = sst [smem:[#allocation32_spill]] %s4061_s6 }
  0x1c   :  { %s4091_s14 = sld [smem:[%s4800_s0 + %s3962_s15]]   ;;  %s3966_s15 = smov 23  }
  0x1d   :  { %s4101_s6 = sld [smem:[%s4800_s0 + %s3964_s28]]   ;;  %s3968_s28 = smov 25  }
  0x1e   :  { %4837 = sst [smem:[#allocation33_spill]] %s4076_s27 }
  0x1f   :  { %4838 = sst [smem:[#allocation34_spill]] %s4081_s4 }
  0x20   :  { %4839 = sst [smem:[#allocation35_spill]] %s4086_s9 }
  0x21   :  { %s4096_s27 = sld [smem:[%s4800_s0 + %s3963_s22]]   ;;  %s3967_s22 = smov 24  }
  0x22   :  { %4840 = sst [smem:[#allocation36_spill]] %s4091_s14 }
  0x23   :  { %4842 = sst [smem:[#allocation38_spill]] %s4101_s6 }
  0x24   :  { %s4106_s9 = sld [smem:[%s4800_s0 + %s3965_s7]]   ;;  %s3969_s7 = smov 26  }
  0x25   :  { %s4111_s14 = sld [smem:[%s4800_s0 + %s3966_s15]]   ;;  %s3970_s15 = smov 27  }
  0x26   :  { %s4121_s6 = sld [smem:[%s4800_s0 + %s3968_s28]]  }
  0x27   :  { %4841 = sst [smem:[#allocation37_spill]] %s4096_s27 }
  0x28   :  { %s4116_s27 = sld [smem:[%s4800_s0 + %s3967_s22]]  }
  0x29   :  { %s4126_s25 = sld [smem:[%s4800_s0 + %s3969_s7]]  }
  0x2a   :  { %s4139_s13 = sld [smem:[%s4800_s0 + %s3972_s1]]   ;;  %s3976_s1 = smov 30  }
  0x2b   :  { %4843 = sst [smem:[#allocation39_spill]] %s4111_s14 }
  0x2c   :  { %4845 = sst [smem:[#allocation41_spill]] %s4121_s6 }
  0x2d   :  { %s3243_s14 = sld [smem:[%s4800_s0 + %s3970_s15]]  }
  0x2e   :  { %4844 = sst [smem:[#allocation40_spill]] %s4116_s27 }
  0x2f   :  { %4846 = sst [smem:[#allocation42_spill]] %s4126_s25 }
  0x30   :  { %s4134_s27 = sld [smem:[%s4800_s0 + %s3971_s23]]   ;;  %s3975_s23 = smov 33  }
  0x31   :  { %s4144_s25 = sld [smem:[%s4800_s0 + %s3973_s10]]  }
  0x32   :  { %s4149_s4 = sld [smem:[%s4800_s0 + %s3974_s16]]  }
  0x33   :  { %v73_v0 = vstv %s3243_s14  ;;  %s3246_s7 = sld [smem:[%s4800_s0 + %s3976_s1]]  }
  0x34   :  { %74 = vst [vmem:[#allocation2] sm:$0x1] %v73_v0 }
  0x36   :  { %4847 = sst [smem:[#allocation43_spill]] %s4134_s27 }
  0x37   :  { %s4154_s27 = sld [smem:[%s4800_s0 + %s3975_s23]]  }
  0x38   :  { %4848 = sst [smem:[#allocation44_spill]] %s4149_s4 }
  0x39   :  { %v75_v1 = vstv %s3246_s7 }
  0x3a   :  { %76 = vst [vmem:[#allocation3] sm:$0x1] %v75_v1 }
  0x3b   :  { %77 = vsyncpa [#allocation5], 0 }
  0x3c   :  { %78 = vsyncpa [#allocation8], 0 }
  0x3d   :  { %79 = vsyncpa [#allocation11], 0 }
  0x3e   :  { %80 = vsyncpa [#allocation14], 0 }
  0x3f   :  { %81 = vsyncpa [#allocation17], 0 }
  0x40   :  { %82 = vsyncpa [#allocation6], 0 }
  0x41   :  { %84 = vsyncpa [#allocation6 + $0x1], 0  ;;  %s4159_s10 = smov 0   ;;  %s4161_s11 = smov 0  }
  0x42   :  { %s4163_s14 = smov 0   ;;  %s4165_s16 = smov 0  }
  0x43 LB: > { %s4849_s8 = sld [smem:[#allocation30_spill]]  ;;  %s4180_s0 = sadd.s32 4294967295, %s3942_s16   ;;  %s3938_s14 = sphi %s4163_s14, %s4899_s14   ;;  %s3934_s11 = sphi %s4161_s11, %s4898_s11   ;;  %s3930_s10 = sphi %s4159_s10, %s4897_s10   ;;  %s3942_s16 = sphi %s4165_s16, %s4894_s16  }
  0x44   : > { %s4850_s6 = sld [smem:[#allocation41_spill]]  ;;  %s3251_s15 = sadd.s32 4294967294, %s3942_s16  }
  0x45   : > { %s4851_s3 = sld [smem:[#allocation29_spill]]  ;;  %s4184_s18 = sadd.s32 1, %s3942_s16  }
  0x46   : > { %4852 = sst [smem:[#allocation45_spill]] %s3930_s10  ;;  %s763_s23 = sadd.s32 1, %s3938_s14 }
  0x47   : > { %4853 = sst [smem:[#allocation46_spill]] %s3938_s14  ;;  %s760_s22 = ssub.s32 %s3942_s16, %s4184_s18 }
  0x48   : > { %4854 = sst [smem:[#allocation47_spill]] %s3942_s16  ;;  %p773_p0 = scmp.ne.s32.totalorder %s3938_s14, %s3934_s11 }
  0x49   : > { %4855 = sst [smem:[#allocation48_spill]] %s4184_s18  ;;  %p761_p1 = scmp.eq.s32.totalorder %s760_s22, 0 }
  0x4a   : > { %p774_p2 = scmp.eq.s32.totalorder %s4180_s0, 1  ;;  %p779_p3 = scmp.ne.s32.totalorder %s3934_s11, %s3930_s10 }
  0x4b   : > { %p780_p4 = scmp.eq.s32.totalorder %s3251_s15, 1  ;;  %p3252_p7 = scmp.ge.s32.totalorder %s3942_s16, 1 }
  0x4c   : > { %s4195_s26 = scalar_select %p761_p1, %s3938_s14, %s763_s23  }
  0x4d   : > { %p4197_p5 = por %p774_p2, %p773_p0  ;;  %p4201_p6 = por %p780_p4, %p779_p3 }
  0x4e   : > { %4856 = sst [smem:[#allocation49_spill]] %s4195_s26  ;;  %p839_p8 = scmp.lt.s32.totalorder %s3942_s16, 3 }
  0x4f   : > { %s4857_s1 = scalar_select %p4197_p5, 1, 0 }
  0x50   : > { %s4859_s28 = scalar_select %p4201_p6, 1, 0 }
  0x51   : > { %4858 = sst [smem:[#allocation50_spill]] %s4857_s1  ;;  %p3459_p9 = scmp.eq.s32.totalorder %s4180_s0, 0 }
  0x52   : > { %4860 = sst [smem:[#allocation51_spill]] %s4859_s28  ;;  %p4208_p10 = pnand %p3252_p7, %p839_p8 }
  0x53   : > { %s869_s7 = sshll.u32 %s4026_s29, 4  ;;  %s3977_s15 = smov [#allocation7]   ;;  %s870_s7 = int_to_ptr.hbm [resolvable:$true] %s869_s7 }
  0x54   : > { %p3430_p11 = pneg %p4208_p10  ;;  %s871_s23 = sshll.u32 %s3977_s15, 4  ;;  %s872_s23 = int_to_ptr.vmem [resolvable:$true] %s871_s23 }
  0x55   : > { %s899_s22 = sshll.u32 %s4046_s19, 4  ;;  %s929_s14 = sshll.u32 %s4066_s12, 4  ;;  %s4222_s22 = int_to_ptr.hbm [resolvable:$true] %s899_s22  ;;  %s4240_s14 = int_to_ptr.hbm [resolvable:$true] %s929_s14 }
  0x56   : > { %p4218_p12 = pnand %p3459_p9, %p3430_p11  ;;  %s3978_s18 = smov [#allocation10]  }
  0x57   : > { %s4225_s28 = sshll.u32 %s3978_s18, 4  ;;  %s3620_s10 = sshra.s32 %s870_s7, 4  ;;  %s3621_s10 = int_to_ptr.hbm [resolvable:$true] %s3620_s10  ;;  %s902_s28 = int_to_ptr.vmem [resolvable:$true] %s4225_s28 }
  0x58   : > { %s3622_s16 = scalar_lea.hbm %s3621_s10, 1  ;;  %p4229_p0 = pneg %p4218_p12 }
  0x59   : > { %p3623_p13 = scmp.ne.s32.totalorder %s3621_s10, %s3622_s16  ;;  %s3627_s4 = scalar_lea.hbm %s4026_s29, 1 }
  0x5a   : > { %p3628_p3 = scmp.lt.s32.totalorder %s3621_s10, %s4026_s29  ;;  %p3629_p4 = scmp.lt.s32.totalorder %s3627_s4, %s3622_s16 }
  0x5b   : > { %p3625_p1 = pnand %p4229_p0, %p3623_p13 }
  0x5c   : > { %p3630_p7 = por %p3629_p4, %p3628_p3 }
  0x5d   : > { %p3626_p2 = pneg %p3625_p1 }
  0x5f   : > { %p3631_p8 = pnand %p3630_p7, %p3626_p2 }
  0x61   : > { %3634 = shalt.err (!%p3631_p8)
}
  0x62   : > { %3436 = dma.hbm_to_vmem [thread:$0]  (!%p4218_p12), %s870_s7, 16, %s872_s23, [#allocation8]  }
  0x63   : > { %s3650_s18 = sshra.s32 %s4222_s22, 4  ;;  %s3657_s4 = scalar_lea.hbm %s4046_s19, 1  ;;  %s3651_s18 = int_to_ptr.hbm [resolvable:$true] %s3650_s18 }
  0x64   : > { %s3652_s1 = scalar_lea.hbm %s3651_s18, 1  ;;  %p3658_p2 = scmp.lt.s32.totalorder %s3651_s18, %s4046_s19 }
  0x65   : > { %p3653_p11 = scmp.ne.s32.totalorder %s3651_s18, %s3652_s1  ;;  %p3659_p3 = scmp.lt.s32.totalorder %s3657_s4, %s3652_s1 }
  0x67   : > { %p3655_p13 = pnand %p3653_p11, %p4229_p0  ;;  %p3660_p4 = por %p3659_p3, %p3658_p2 }
  0x69   : > { %p3656_p1 = pneg %p3655_p13 }
  0x6b   : > { %p3661_p7 = pnand %p3660_p4, %p3656_p1 }
  0x6d   : > { %3664 = shalt.err (!%p3661_p7)
}
  0x6e   : > { %3442 = dma.hbm_to_vmem [thread:$0]  (!%p4218_p12), %s4222_s22, 16, %s902_s28, [#allocation11]  }
  0x6f   : > { %s854_s10 = sshll.u32 %s4016_s21, 4  ;;  %s3979_s16 = smov [#allocation13]   ;;  %s4251_s10 = int_to_ptr.hbm [resolvable:$true] %s854_s10 }
  0x70   : > { %s931_s7 = sshll.u32 %s3979_s16, 4  ;;  %s3680_s23 = sshra.s32 %s4240_s14, 4  ;;  %s932_s7 = int_to_ptr.vmem [resolvable:$true] %s931_s7  ;;  %s3681_s23 = int_to_ptr.hbm [resolvable:$true] %s3680_s23 }
  0x71   : > { %s3682_s1 = scalar_lea.hbm %s3681_s23, 1  ;;  %s3687_s18 = scalar_lea.hbm %s4066_s12, 1 }
  0x72   : > { %p3683_p8 = scmp.ne.s32.totalorder %s3681_s23, %s3682_s1  ;;  %p3688_p1 = scmp.lt.s32.totalorder %s3681_s23, %s4066_s12 }
  0x73   : > { %p3689_p2 = scmp.lt.s32.totalorder %s3687_s18, %s3682_s1 }
  0x74   : > { %p3685_p11 = pnand %p3683_p8, %p4229_p0 }
  0x75   : > { %p3690_p3 = por %p3689_p2, %p3688_p1 }
  0x76   : > { %p3686_p13 = pneg %p3685_p11 }
  0x78   : > { %p3691_p4 = pnand %p3690_p3, %p3686_p13 }
  0x7a   : > { %3694 = shalt.err (!%p3691_p4)
}
  0x7b   : > { %3448 = dma.hbm_to_vmem [thread:$0]  (!%p4218_p12), %s4240_s14, 16, %s932_s7, [#allocation14]  }
  0x7c   : > { %s3980_s28 = smov [#allocation4]   ;;  %s884_s4 = sshll.u32 %s4849_s8, 4  ;;  %s4262_s4 = int_to_ptr.hbm [resolvable:$true] %s884_s4 }
  0x7d   : > { %s856_s22 = sshll.u32 %s3980_s28, 4  ;;  %s3710_s16 = sshra.s32 %s4251_s10, 4  ;;  %s857_s22 = int_to_ptr.vmem [resolvable:$true] %s856_s22  ;;  %s3711_s16 = int_to_ptr.hbm [resolvable:$true] %s3710_s16 }
  0x7e   : > { %s3712_s23 = scalar_lea.hbm %s3711_s16, 1  ;;  %s3717_s1 = scalar_lea.hbm %s4016_s21, 1 }
  0x7f   : > { %p3713_p7 = scmp.ne.s32.totalorder %s3711_s16, %s3712_s23  ;;  %p3718_p13 = scmp.lt.s32.totalorder %s3711_s16, %s4016_s21 }
  0x80   : > { %p3719_p1 = scmp.lt.s32.totalorder %s3717_s1, %s3712_s23 }
  0x81   : > { %p3715_p8 = pnand %p3713_p7, %p4229_p0 }
  0x82   : > { %p3720_p2 = por %p3719_p1, %p3718_p13 }
  0x83   : > { %p3716_p11 = pneg %p3715_p8 }
  0x85   : > { %p3721_p3 = pnand %p3720_p2, %p3716_p11 }
  0x87   : > { %3724 = shalt.err (!%p3721_p3)
}
  0x88   : > { %3433 = dma.hbm_to_vmem [thread:$0]  (!%p4218_p12), %s4251_s10, 16, %s857_s22, [#allocation5]  }
  0x89   : > { %s914_s14 = sshll.u32 %s4056_s30, 4  ;;  %s3981_s7 = smov [#allocation9]   ;;  %s4273_s14 = int_to_ptr.hbm [resolvable:$true] %s914_s14 }
  0x8a   : > { %s886_s18 = sshll.u32 %s3981_s7, 4  ;;  %s3740_s28 = sshra.s32 %s4262_s4, 4  ;;  %s887_s18 = int_to_ptr.vmem [resolvable:$true] %s886_s18  ;;  %s3741_s28 = int_to_ptr.hbm [resolvable:$true] %s3740_s28 }
  0x8b   : > { %s3742_s16 = scalar_lea.hbm %s3741_s28, 1  ;;  %s3747_s23 = scalar_lea.hbm %s4849_s8, 1 }
  0x8c   : > { %p3743_p4 = scmp.ne.s32.totalorder %s3741_s28, %s3742_s16  ;;  %p3748_p11 = scmp.lt.s32.totalorder %s3741_s28, %s4849_s8 }
  0x8d   : > { %p3749_p13 = scmp.lt.s32.totalorder %s3747_s23, %s3742_s16 }
  0x8e   : > { %p3745_p7 = pnand %p3743_p4, %p4229_p0 }
  0x8f   : > { %p3750_p1 = por %p3749_p13, %p3748_p11 }
  0x90   : > { %p3746_p8 = pneg %p3745_p7 }
  0x92   : > { %p3751_p2 = pnand %p3750_p1, %p3746_p8 }
  0x94   : > { %3754 = shalt.err (!%p3751_p2)
}
  0x95   : > { %3439 = dma.hbm_to_vmem [thread:$0]  (!%p4218_p12), %s4262_s4, 16, %s887_s18, [#allocation8]  }
  0x96   : > { %s3982_s10 = smov [#allocation12]   ;;  %s962_s1 = sshll.u32 %s4106_s9, 4  ;;  %s4284_s1 = int_to_ptr.hbm [resolvable:$true] %s962_s1 }
  0x97   : > { %s916_s22 = sshll.u32 %s3982_s10, 4  ;;  %s3770_s7 = sshra.s32 %s4273_s14, 4  ;;  %s917_s22 = int_to_ptr.vmem [resolvable:$true] %s916_s22  ;;  %s3771_s7 = int_to_ptr.hbm [resolvable:$true] %s3770_s7 }
  0x98   : > { %s3772_s28 = scalar_lea.hbm %s3771_s7, 1  ;;  %s3777_s16 = scalar_lea.hbm %s4056_s30, 1 }
  0x99   : > { %p3773_p3 = scmp.ne.s32.totalorder %s3771_s7, %s3772_s28  ;;  %p3778_p8 = scmp.lt.s32.totalorder %s3771_s7, %s4056_s30 }
  0x9a   : > { %p3779_p11 = scmp.lt.s32.totalorder %s3777_s16, %s3772_s28 }
  0x9b   : > { %p3775_p4 = pnand %p3773_p3, %p4229_p0 }
  0x9c   : > { %p3780_p13 = por %p3779_p11, %p3778_p8 }
  0x9d   : > { %p3776_p7 = pneg %p3775_p4 }
  0x9f   : > { %p3781_p1 = pnand %p3780_p13, %p3776_p7 }
  0xa1   : > { %3784 = shalt.err (!%p3781_p1)
}
  0xa2   : > { %3445 = dma.hbm_to_vmem [thread:$0]  (!%p4218_p12), %s4273_s14, 16, %s917_s22, [#allocation11]  }
  0xa3   : > { %s980_s4 = sshll.u32 %s4850_s6, 4  ;;  %s3983_s18 = smov [#allocation15]   ;;  %s4295_s4 = int_to_ptr.hbm [resolvable:$true] %s980_s4 }
  0xa4   : > { %s964_s23 = sshll.u32 %s3983_s18, 4  ;;  %s3800_s10 = sshra.s32 %s4284_s1, 4  ;;  %s965_s23 = int_to_ptr.vmem [resolvable:$true] %s964_s23  ;;  %s3801_s10 = int_to_ptr.hbm [resolvable:$true] %s3800_s10 }
  0xa5   : > { %s3802_s7 = scalar_lea.hbm %s3801_s10, 1  ;;  %s3807_s28 = scalar_lea.hbm %s4106_s9, 1 }
  0xa6   : > { %p3803_p2 = scmp.ne.s32.totalorder %s3801_s10, %s3802_s7  ;;  %p3808_p7 = scmp.lt.s32.totalorder %s3801_s10, %s4106_s9 }
  0xa7   : > { %p3809_p8 = scmp.lt.s32.totalorder %s3807_s28, %s3802_s7 }
  0xa8   : > { %p3805_p3 = pnand %p3803_p2, %p4229_p0 }
  0xa9   : > { %p3810_p11 = por %p3809_p8, %p3808_p7 }
  0xaa   : > { %p3806_p4 = pneg %p3805_p3 }
  0xac   : > { %p3811_p13 = pnand %p3810_p11, %p3806_p4 }
  0xae   : > { %3814 = shalt.err (!%p3811_p13)
}
  0xaf   : > { %3451 = dma.hbm_to_vmem [thread:$0]  (!%p4218_p12), %s4284_s1, 16, %s965_s23, [#allocation14]  }
  0xb0   : > { %s3984_s14 = smov [#allocation16]   ;;  %s3830_s16 = sshra.s32 %s4295_s4, 4  ;;  %s3831_s16 = int_to_ptr.hbm [resolvable:$true] %s3830_s16 }
  0xb1   : > { %s982_s22 = sshll.u32 %s3984_s14, 4  ;;  %s3832_s18 = scalar_lea.hbm %s3831_s16, 1  ;;  %s983_s22 = int_to_ptr.vmem [resolvable:$true] %s982_s22 }
  0xb2   : > { %p3833_p1 = scmp.ne.s32.totalorder %s3831_s16, %s3832_s18  ;;  %s3837_s10 = scalar_lea.hbm %s4850_s6, 1 }
  0xb3   : > { %p3838_p4 = scmp.lt.s32.totalorder %s3831_s16, %s4850_s6  ;;  %p3839_p7 = scmp.lt.s32.totalorder %s3837_s10, %s3832_s18 }
  0xb4   : > { %p3835_p2 = pnand %p3833_p1, %p4229_p0 }
  0xb5   : > { %p3840_p8 = por %p3839_p7, %p3838_p4 }
  0xb6   : > { %p3836_p3 = pneg %p3835_p2 }
  0xb8   : > { %p3841_p11 = pnand %p3840_p8, %p3836_p3 }
  0xba   : > { %3844 = shalt.err (!%p3841_p11)
}
  0xbb   : > { %3454 = dma.hbm_to_vmem [thread:$0]  (!%p4218_p12), %s4295_s4, 16, %s983_s22, [#allocation17]  }
  0xbc   : > { %1038 = sbr.rel (%p4208_p10) target bundleno = 1666 (0x682), region = 144 }
  0xc1   : > { %3905 = dma.done.wait (%p3459_p9), [#allocation5], 16  }
  0xc2   : > { %3907 = vsyncadd (%p3459_p9), [#allocation5], 4294967280 }
  0xc3   : > { %3909 = dma.done.wait (%p3459_p9), [#allocation8], 32  }
  0xc4   : > { %3911 = vsyncadd (%p3459_p9), [#allocation8], 4294967264 }
  0xc5   : > { %3913 = dma.done.wait (%p3459_p9), [#allocation11], 32  }
  0xc6   : > { %3915 = vsyncadd (%p3459_p9), [#allocation11], 4294967264 }
  0xc7   : > { %3917 = dma.done.wait (%p3459_p9), [#allocation14], 32  }
  0xc8   : > { %3919 = vsyncadd (%p3459_p9), [#allocation14], 4294967264 }
  0xc9   : > { %3921 = dma.done.wait (%p3459_p9), [#allocation17], 16  }
  0xca   : > { %3923 = vsyncadd (%p3459_p9), [#allocation17], 4294967280  ;;  %s4864_s5 = sld [smem:[#allocation25_spill]]  ;;  %s3272_s26 = sshll.u32 %s4180_s0, 1  ;;  %v1226_v2 = vld [vmem:[%s4011_s17 + $0x18] sm:$0xff]  ;;  %v1225_v3 = vld [vmem:[%s4011_s17 + $0x10] sm:$0xff] }
  0xcb   : > { %p1181_p10 = scmp.lt.s32.totalorder %s3272_s26, 3  ;;  %1250 = vmatpush.msra.mxu0 %v1226_v2  ;;  %3387 = vmatpush.msra.mxu2 %v1226_v2  ;;  %v1224_v4 = vld [vmem:[%s4011_s17 + $0x8] sm:$0xff]  ;;  %v1223_v5 = vld [vmem:[%s4011_s17] sm:$0xff]  ;;  %vm1231_vm0 = vcmask 261120   ;;  %v1305_v8 = vld [vmem:[%s4851_s3 + $0x18] sm:$0xff]  ;;  %s4865_s1 = sld [smem:[#allocation34_spill]] }
  0xcc   : > { %v1377_v9 = vld [vmem:[%s4051_s24 + $0x18] sm:$0xff]  ;;  %v1304_v10 = vld [vmem:[%s4851_s3 + $0x10] sm:$0xff]  ;;  %v1303_v12 = vld [vmem:[%s4851_s3 + $0x8] sm:$0xff]  ;;  %s4866_s4 = sld [smem:[#allocation27_spill]]  ;;  %vm1466_vm1 = vcmask 1045504   ;;  %vm1447_vm2 = vcmask 48128  }
  0xcd   : > { %s4901_s26 = smov (!%p1181_p10, %s3272_s26), 3  ;;  %1251 = vmatpush.msra.mxu0 %v1225_v3  ;;  %3388 = vmatpush.msra.mxu2 %v1225_v3  ;;  %v1376_v11 = vld [vmem:[%s4051_s24 + $0x10] sm:$0xff]  ;;  %v1375_v13 = vld [vmem:[%s4051_s24 + $0x8] sm:$0xff]  ;;  %v1302_v14 = vld [vmem:[%s4851_s3] sm:$0xff]  ;;  %s4867_s23 = sld [smem:[#allocation28_spill]]  ;;  %vm1513_vm3 = vcmask 130048  }
  0xce   : > { %s4339_s2 = sshll.u32 %s4901_s26, 3  ;;  %v1374_v15 = vld [vmem:[%s4051_s24] sm:$0xff]  ;;  %s4819_s7 = smul.u32 24, %s4901_s26  ;;  %v3557_v41 = vld [vmem:[#allocation12] ss:$0 sm:$0xff]  ;;  %vm1993_vm4 = vcmask 64512  }
  0xcf   : > { %1252 = vmatpush.msra.mxu0 %v1224_v4  ;;  %3389 = vmatpush.msra.mxu2 %v1224_v4  ;;  %v1446_v16 = vld [vmem:[%s4071_s20] sm:$0x3f]  ;;  %s4868_s14 = sld [smem:[#allocation32_spill]]  ;;  %v3558_v50 = vld [vmem:[#allocation9] ss:$0 sm:$0xff]  ;;  %s3880_s8 = scalar_lea.hbm %s4144_s25, 32 }
  0xd0   : > { %s4345_s15 = scalar_lea.vmem %s4864_s5, %s4339_s2  ;;  %s4870_s16 = sld [smem:[#allocation31_spill]]  ;;  %v3556_v36 = vld [vmem:[#allocation4] ss:$0 sm:$0xff] }
  0xd1   : > { %v4350_v6 = vld [vmem:[%s4345_s15] sm:$0xff]  ;;  %v4353_v7 = vld [vmem:[%s4345_s15 + $0x8] sm:$0xff]  ;;  %1253 = vmatpush.msra.mxu0 %v1223_v5  ;;  %3390 = vmatpush.msra.mxu2 %v1223_v5  ;;  %s4872_s10 = sld [smem:[#allocation35_spill]] }
  0xd2   : > { %3282 = vmatmul.msk.f32.vlgmr.msra.gmra.mxu0 %vm1231_vm0, %v4350_v6  ;;  %3283 = vmatmul.msk.f32.vlgmr.msra.gmra.mxu2 %vm1231_vm0, %v4353_v7  ;;  %v1573_v17 = vld [vmem:[%s4865_s1] sm:$0x3f]  ;;  %s1197_s28 = scalar_lea.vmem %s4866_s4, %s4819_s7  ;;  %s4874_s4 = sld [smem:[#allocation33_spill]] }
  0xd3   : > { %1322 = vmatpush.msrb.mxu2 %v1305_v8  ;;  %1394 = vmatpush.msrb.mxu0 %v1377_v9  ;;  %v4383_v18 = vld [vmem:[%s1197_s28] sm:$0xff]  ;;  %v4389_v19 = vld [vmem:[%s1197_s28 + $0x8] sm:$0xff]  ;;  %v1266_v20 = vld [vmem:[%s4867_s23 + $0x18] sm:$0xff] }
  0xd4   : > { %1289 = vmatpush.msra.mxu1 %v1266_v20  ;;  %3391 = vmatpush.msra.mxu3 %v1266_v20  ;;  %v4396_v21 = vld [vmem:[%s1197_s28 + $0x10] sm:$0xff]  ;;  %v4402_v22 = vld [vmem:[%s1197_s28 + $0x18] sm:$0xff]  ;;  %v4408_v23 = vld [vmem:[%s1197_s28 + $0x20] sm:$0xff] }
  0xd5   : > { %1323 = vmatpush.msrb.mxu2 %v1304_v10  ;;  %1395 = vmatpush.msrb.mxu0 %v1376_v11  ;;  %s4869_s22 = smov %s4868_s14  ;;  %v4414_v24 = vld [vmem:[%s1197_s28 + $0x28] sm:$0xff]  ;;  %v1265_v25 = vld [vmem:[%s4867_s23 + $0x10] sm:$0xff]  ;;  %v1263_v27 = vld [vmem:[%s4867_s23] sm:$0xff]  ;;  %s4875_s28 = sld [smem:[#allocation36_spill]] }
  0xd6   : > { %s4871_s18 = smov %s4870_s16  ;;  %1290 = vmatpush.msra.mxu1 %v1265_v25  ;;  %3392 = vmatpush.msra.mxu3 %v1265_v25  ;;  %v1264_v26 = vld [vmem:[%s4867_s23 + $0x8] sm:$0xff]  ;;  %v1410_v28 = vld [vmem:[%s4868_s14 + $0x18] sm:$0xff]  ;;  %v1409_v29 = vld [vmem:[%s4869_s22 + $0x10] sm:$0xff]  ;;  %s4876_s14 = sld [smem:[#allocation37_spill]] }
  0xd7   : > { %1324 = vmatpush.msrb.mxu2 %v1303_v12  ;;  %1396 = vmatpush.msrb.mxu0 %v1375_v13  ;;  %v1408_v30 = vld [vmem:[%s4869_s22 + $0x8] sm:$0xff]  ;;  %s4873_s1 = smov %s4872_s10  ;;  %v1338_v31 = vld [vmem:[%s4870_s16 + $0x18] sm:$0xff]  ;;  %v1407_v32 = vld [vmem:[%s4869_s22] sm:$0xff]  ;;  %s4878_s16 = sld [smem:[#allocation38_spill]] }
  0xd8   : > { %1291 = vmatpush.msra.mxu1 %v1264_v26  ;;  %3393 = vmatpush.msra.mxu3 %v1264_v26  ;;  %v1337_v33 = vld [vmem:[%s4871_s18 + $0x10] sm:$0xff]  ;;  %v1336_v34 = vld [vmem:[%s4871_s18 + $0x8] sm:$0xff]  ;;  %v1335_v35 = vld [vmem:[%s4871_s18] sm:$0xff] }
  0xd9   : > { %1325 = vmatpush.msrb.mxu2 %v1302_v14  ;;  %1397 = vmatpush.msrb.mxu0 %v1374_v15  ;;  %v1619_v40 = vld [vmem:[%s4872_s10 + $0x8] sm:$0xff]  ;;  %v1618_v42 = vld [vmem:[%s4873_s1] sm:$0xff]  ;;  %s4880_s10 = sld [smem:[#allocation40_spill]] }
  0xda   : > { %3286 = vmatmul.msk.f32.vlgmr.msrb.gmra.mxu2 %vm1231_vm0, %v4350_v6  ;;  %3290 = vmatmul.msk.f32.vlgmr.msrb.gmra.mxu0 %vm1231_vm0, %v4350_v6  ;;  %v1512_v48 = vld [vmem:[%s4874_s4 + $0x8] sm:$0xff]  ;;  %v1511_v51 = vld [vmem:[%s4874_s4] sm:$0xff] }
  0xdb   : > { %3294 = vmatpush.msk.msra.mxu2 %vm1466_vm1, %v1446_v16  ;;  %3307 = vmatpush.msk.msra.mxu0 %vm1466_vm1, %v1573_v17 }
  0xdc   : > { %1292 = vmatpush.msra.mxu1 %v1263_v27  ;;  %3394 = vmatpush.msra.mxu3 %v1263_v27 }
  0xdd   : > { %s4879_s7 = smov %s4878_s16 }
  0xde   : > { %1433 = vmatpush.msrb.mxu1 %v1410_v28  ;;  %1361 = vmatpush.msrb.mxu3 %v1338_v31 }
  0xe0   : > { %1434 = vmatpush.msrb.mxu1 %v1409_v29  ;;  %1362 = vmatpush.msrb.mxu3 %v1337_v33  ;;  %v3561_v33 = vld [vmem:[#allocation10] ss:$0 sm:$0xff] }
  0xe2   : > { %3287 = vmatmul.msk.f32.gmra.mxu2 %vm1231_vm0, %v4353_v7  ;;  %3291 = vmatmul.msk.f32.gmra.mxu0 %vm1231_vm0, %v4353_v7 }
  0xe3   : > { %1435 = vmatpush.msrb.mxu1 %v1408_v30  ;;  %1363 = vmatpush.msrb.mxu3 %v1336_v34  ;;  %v3559_v34 = vld [vmem:[#allocation7] ss:$0 sm:$0xff] }
  0xe5   : > { %1436 = vmatpush.msrb.mxu1 %v1407_v32  ;;  %1364 = vmatpush.msrb.mxu3 %v1335_v35 }
  0xea   : > { %3295 = vmatmul.msk.f32.vlgmr.msra.gmra.mxu2 %vm1447_vm2, %v4383_v18  ;;  %3308 = vmatmul.msk.f32.vlgmr.msra.gmra.mxu0 %vm1447_vm2, %v4383_v18 }
  0xf2   : > { %3296 = vmatmul.msk.f32.gmra.mxu2 %vm1447_vm2, %v4389_v19  ;;  %3309 = vmatmul.msk.f32.gmra.mxu0 %vm1447_vm2, %v4389_v19 }
  0xfa   : > { %3297 = vmatmul.msk.f32.gmra.mxu2 %vm1447_vm2, %v4396_v21  ;;  %3310 = vmatmul.msk.f32.gmra.mxu0 %vm1447_vm2, %v4396_v21 }
 0x102   : > { %3298 = vmatmul.msk.f32.gmra.mxu2 %vm1447_vm2, %v4402_v22  ;;  %3311 = vmatmul.msk.f32.gmra.mxu0 %vm1447_vm2, %v4402_v22 }
 0x10a   : > { %3299 = vmatmul.msk.f32.gmra.mxu2 %vm1447_vm2, %v4408_v23  ;;  %3312 = vmatmul.msk.f32.gmra.mxu0 %vm1447_vm2, %v4408_v23 }
 0x112   : > { %3300 = vmatmul.msk.f32.gmra.mxu2 %vm1447_vm2, %v4414_v24  ;;  %3313 = vmatmul.msk.f32.gmra.mxu0 %vm1447_vm2, %v4414_v24 }
 0x14f   : > { %v1255_v37 = vpop.f32.mrf.mxu0 }
 0x150   : > { %v1256_v38 = vadd.f32 %v3556_v36, %v1255_v37 }
 0x152   : > { %v1261_v39 = vmax.f32 %v1256_v38, 0.0 }
 0x154   : > { %3284 = vmatmul.msk.f32.vlgmr.msra.gmra.mxu1 %vm1231_vm0, %v1261_v39 }
 0x155   : > { %v1258_v43 = vpop.f32.mrf.mxu2  ;;  %1652 = vmatpush.msra.mxu1 %v1619_v40 }
 0x156   : > { %v1259_v44 = vadd.f32 %v3556_v36, %v1258_v43 }
 0x157   : > { %v1399_v45 = vpop.f32.mrf.mxu0  ;;  %1653 = vmatpush.msra.mxu1 %v1618_v42 }
 0x158   : > { %v1262_v46 = vmax.f32 %v1259_v44, 0.0  ;;  %v1400_v47 = vadd.f32 %v3557_v41, %v1399_v45 }
 0x15a   : > { %v1405_v49 = vmax.f32 %v1400_v47, 0.0  ;;  %3285 = vmatmul.msk.f32.vlgmr.msra.gmra.mxu3 %vm1231_vm0, %v1262_v46 }
 0x15b   : > { %1546 = vmatpush.msra.mxu3 %v1512_v48 }
 0x15c   : > { %3292 = vmatmul.msk.f32.vlgmr.msrb.gmra.mxu1 %vm1231_vm0, %v1405_v49 }
 0x15d   : > { %v1327_v52 = vpop.f32.mrf.mxu2  ;;  %1547 = vmatpush.msra.mxu3 %v1511_v51 }
 0x15e   : > { %v1328_v53 = vadd.f32 %v3558_v50, %v1327_v52 }
 0x15f   : > { %v1402_v54 = vpop.f32.mrf.mxu0 }
 0x160   : > { %v1333_v55 = vmax.f32 %v1328_v53, 0.0  ;;  %v1403_v56 = vadd.f32 %v3557_v41, %v1402_v54 }
 0x162   : > { %v1406_v57 = vmax.f32 %v1403_v56, 0.0  ;;  %3288 = vmatmul.msk.f32.vlgmr.msrb.gmra.mxu3 %vm1231_vm0, %v1333_v55  ;;  %v1679_v55 = vld [vmem:[%s4875_s28] sm:$0x3f]  ;;  %s4877_s28 = smov %s4876_s14 }
 0x163   : > { %3320 = vmatpush.msk.msrb.mxu2 %vm1466_vm1, %v1679_v55 }
 0x164   : > { %3293 = vmatmul.msk.f32.gmra.mxu1 %vm1231_vm0, %v1406_v57  ;;  %3321 = vmatmul.msk.f32.vlgmr.msrb.gmra.mxu2 %vm1447_vm2, %v4383_v18 }
 0x165   : > { %v1330_v58 = vpop.f32.mrf.mxu2 }
 0x166   : > { %v1331_v59 = vadd.f32 %v3558_v50, %v1330_v58  ;;  %v3560_v58 = vld [vmem:[#allocation13] ss:$0 sm:$0xff] }
 0x167   : > { %v1594_v60 = vpop.f32.mrf.mxu0 }
 0x168   : > { %v1334_v61 = vmax.f32 %v1331_v59, 0.0  ;;  %v1612_v62 = vmax.f32 %v1594_v60, 0.0 }
 0x16a   : > { %3289 = vmatmul.msk.f32.gmra.mxu3 %vm1231_vm0, %v1334_v61 }
 0x16c   : > { %3314 = vmatmul.msk.f32.vlgmr.msra.gmra.mxu1 %vm1513_vm3, %v1612_v62  ;;  %3322 = vmatmul.msk.f32.gmra.mxu2 %vm1447_vm2, %v4389_v19 }
 0x16d   : > { %v1487_v63 = vpop.f32.mrf.mxu2 }
 0x16e   : > { %v1505_v0 = vmax.f32 %v1487_v63, 0.0 }
 0x16f   : > { %v1597_v1 = vpop.f32.mrf.mxu0 }
 0x170   : > { %v1613_v2 = vmax.f32 %v1597_v1, 0.0 }
 0x172   : > { %3301 = vmatmul.msk.f32.vlgmr.msra.gmra.mxu3 %vm1513_vm3, %v1505_v0 }
 0x174   : > { %3315 = vmatmul.msk.f32.gmra.mxu1 %vm1513_vm3, %v1613_v2  ;;  %3323 = vmatmul.msk.f32.gmra.mxu2 %vm1447_vm2, %v4396_v21 }
 0x175   : > { %v1490_v3 = vpop.f32.mrf.mxu2 }
 0x176   : > { %v1506_v4 = vmax.f32 %v1490_v3, 0.0 }
 0x177   : > { %v1600_v5 = vpop.f32.mrf.mxu0 }
 0x178   : > { %v1614_v8 = vmax.f32 %v1600_v5, 0.0 }
 0x17a   : > { %3302 = vmatmul.msk.f32.gmra.mxu3 %vm1513_vm3, %v1506_v4 }
 0x17c   : > { %3316 = vmatmul.msk.f32.gmra.mxu1 %vm1513_vm3, %v1614_v8  ;;  %3324 = vmatmul.msk.f32.gmra.mxu2 %vm1447_vm2, %v4402_v22 }
 0x17d   : > { %v1493_v9 = vpop.f32.mrf.mxu2 }
 0x17e   : > { %v1507_v10 = vmax.f32 %v1493_v9, 0.0 }
 0x17f   : > { %v1603_v11 = vpop.f32.mrf.mxu0 }
 0x180   : > { %v1615_v12 = vmax.f32 %v1603_v11, 0.0 }
 0x182   : > { %3303 = vmatmul.msk.f32.gmra.mxu3 %vm1513_vm3, %v1507_v10 }
 0x184   : > { %3317 = vmatmul.msk.f32.gmra.mxu1 %vm1513_vm3, %v1615_v12  ;;  %3325 = vmatmul.msk.f32.gmra.mxu2 %vm1447_vm2, %v4408_v23 }
 0x185   : > { %v1496_v13 = vpop.f32.mrf.mxu2 }
 0x186   : > { %v1508_v14 = vmax.f32 %v1496_v13, 0.0 }
 0x187   : > { %v1606_v15 = vpop.f32.mrf.mxu0 }
 0x188   : > { %v1616_v16 = vmax.f32 %v1606_v15, 0.0 }
 0x18a   : > { %3304 = vmatmul.msk.f32.gmra.mxu3 %vm1513_vm3, %v1508_v14 }
 0x18c   : > { %3318 = vmatmul.msk.f32.gmra.mxu1 %vm1513_vm3, %v1616_v16  ;;  %3326 = vmatmul.msk.f32.gmra.mxu2 %vm1447_vm2, %v4414_v24 }
 0x18d   : > { %v1499_v17 = vpop.f32.mrf.mxu2 }
 0x18e   : > { %v1509_v20 = vmax.f32 %v1499_v17, 0.0 }
 0x18f   : > { %v1609_v25 = vpop.f32.mrf.mxu0 }
 0x190   : > { %v1617_v26 = vmax.f32 %v1609_v25, 0.0  ;;  %v1724_v25 = vld [vmem:[%s4877_s28] sm:$0xff] }
 0x192   : > { %3305 = vmatmul.msk.f32.gmra.mxu3 %vm1513_vm3, %v1509_v20  ;;  %v1725_v20 = vld [vmem:[%s4876_s14 + $0x8] sm:$0xff]  ;;  %s4881_s14 = sld [smem:[#allocation39_spill]] }
 0x193   : > { %1758 = vmatpush.msrb.mxu3 %v1725_v20 }
 0x194   : > { %3319 = vmatmul.msk.f32.gmra.mxu1 %vm1513_vm3, %v1617_v26 }
 0x195   : > { %v1502_v27 = vpop.f32.mrf.mxu2  ;;  %1759 = vmatpush.msrb.mxu3 %v1724_v25 }
 0x196   : > { %v1510_v28 = vmax.f32 %v1502_v27, 0.0 }
 0x198   : > { %s4882_s1 = smov %s4881_s14 }
 0x19a   : > { %3306 = vmatmul.msk.f32.gmra.mxu3 %vm1513_vm3, %v1510_v28 }
 0x1d1   : > { %v1294_v29 = vpop.f32.mrf.mxu1 }
 0x1d2   : > { %v1295_v37 = vadd.f32 %v3559_v34, %v1294_v29 }
 0x1d4   : > { %v1300_v41 = vmax.f32 %v1295_v37, 0.0 }
 0x1d9   : > { %v1438_v30 = vpop.f32.mrf.mxu1 }
 0x1da   : > { %v4467_v61 = vadd.f32 %v3560_v58, %v1438_v30 }
 0x1dc   : > { %v1444_v0 = vmax.f32 %v4467_v61, 0.0 }
 0x1dd   : > { %v1297_v31 = vpop.f32.mrf.mxu3 }
 0x1de   : > { %v1298_v44 = vadd.f32 %v3559_v34, %v1297_v31 }
 0x1e0   : > { %v1301_v48 = vmax.f32 %v1298_v44, 0.0 }
 0x1e1   : > { %v1441_v32 = vpop.f32.mrf.mxu1 }
 0x1e2   : > { %v4476_v3 = vadd.f32 %v3560_v58, %v1441_v32 }
 0x1e4   : > { %v1445_v8 = vmax.f32 %v4476_v3, 0.0 }
 0x1e5   : > { %v1366_v35 = vpop.f32.mrf.mxu3 }
 0x1e6   : > { %v1367_v36 = vadd.f32 %v3561_v33, %v1366_v35 }
 0x1e7   : > { %v1700_v28 = vpop.f32.mrf.mxu2 }
 0x1e8   : > { %v1372_v38 = vmax.f32 %v1367_v36, 0.0  ;;  %v1718_v30 = vmax.f32 %v1700_v28, 0.0 }
 0x1e9   : > { %v1655_v39 = vpop.f32.mrf.mxu1 }
 0x1ea   : > { %v1673_v40 = vmax.f32 %v1655_v39, 0.0  ;;  %3333 = vmatpush.xpose.msk.msrb.mxu0 %vm1231_vm0, %v1372_v38  ;;  %3327 = vmatmul.msk.f32.vlgmr.msrb.gmra.mxu3 %vm1513_vm3, %v1718_v30 }
 0x1ed   : > { %v1369_v42 = vpop.f32.mrf.mxu3  ;;  %3334 = vmatmul.msk.f32.vlgmr.msrb.gmra.mxu0 %vm1231_vm0, %v1300_v41 }
 0x1ee   : > { %3337 = vmatpush.xpose.msk.msra.mxu0 %vm1447_vm2, %v1673_v40  ;;  %v1370_v43 = vadd.f32 %v3561_v33, %v1369_v42 }
 0x1ef   : > { %v1703_v38 = vpop.f32.mrf.mxu2 }
 0x1f0   : > { %v1373_v45 = vmax.f32 %v1370_v43, 0.0  ;;  %v1719_v39 = vmax.f32 %v1703_v38, 0.0 }
 0x1f1   : > { %v1658_v46 = vpop.f32.mrf.mxu1 }
 0x1f2   : > { %v1674_v47 = vmax.f32 %v1658_v46, 0.0  ;;  %3335 = vmatpush.xpose.msk.msrb.mxu1 %vm1231_vm0, %v1373_v45  ;;  %3328 = vmatmul.msk.f32.gmra.mxu3 %vm1513_vm3, %v1719_v39 }
 0x1f5   : > { %v1549_v49 = vpop.f32.mrf.mxu3  ;;  %3336 = vmatmul.msk.f32.vlgmr.msrb.gmra.mxu1 %vm1231_vm0, %v1301_v48 }
 0x1f6   : > { %3339 = vmatpush.xpose.msk.msra.mxu1 %vm1447_vm2, %v1674_v47  ;;  %v1567_v50 = vmax.f32 %v1549_v49, 0.0 }
 0x1f7   : > { %v1706_v40 = vpop.f32.mrf.mxu2 }
 0x1f8   : > { %3338 = vmatmul.msk.f32.vlgmr.msra.gmra.mxu0 %vm1447_vm2, %v1567_v50  ;;  %v1720_v41 = vmax.f32 %v1706_v40, 0.0 }
 0x1f9   : > { %v1661_v51 = vpop.f32.mrf.mxu1 }
 0x1fa   : > { %v1675_v52 = vmax.f32 %v1661_v51, 0.0  ;;  %3329 = vmatmul.msk.f32.gmra.mxu3 %vm1513_vm3, %v1720_v41 }
 0x1fc   : > { %3341 = vmatpush.xpose.msk.msrb.mxu0 %vm1447_vm2, %v1675_v52 }
 0x1fd   : > { %v1552_v53 = vpop.f32.mrf.mxu3 }
 0x1fe   : > { %v1568_v54 = vmax.f32 %v1552_v53, 0.0 }
 0x1ff   : > { %v1709_v42 = vpop.f32.mrf.mxu2 }
 0x200   : > { %3340 = vmatmul.msk.f32.vlgmr.msra.gmra.mxu1 %vm1447_vm2, %v1568_v54  ;;  %v1721_v43 = vmax.f32 %v1709_v42, 0.0 }
 0x201   : > { %v1664_v56 = vpop.f32.mrf.mxu1 }
 0x202   : > { %v1676_v57 = vmax.f32 %v1664_v56, 0.0  ;;  %3330 = vmatmul.msk.f32.gmra.mxu3 %vm1513_vm3, %v1721_v43 }
 0x204   : > { %3343 = vmatpush.xpose.msk.msrb.mxu1 %vm1447_vm2, %v1676_v57 }
 0x205   : > { %v1555_v59 = vpop.f32.mrf.mxu3 }
 0x206   : > { %v1569_v60 = vmax.f32 %v1555_v59, 0.0 }
 0x207   : > { %v1712_v44 = vpop.f32.mrf.mxu2 }
 0x208   : > { %3342 = vmatmul.msk.f32.vlgmr.msrb.gmra.mxu0 %vm1447_vm2, %v1569_v60  ;;  %v1722_v45 = vmax.f32 %v1712_v44, 0.0 }
 0x209   : > { %v1667_v62 = vpop.f32.mrf.mxu1 }
 0x20a   : > { %v1677_v63 = vmax.f32 %v1667_v62, 0.0  ;;  %3331 = vmatmul.msk.f32.gmra.mxu3 %vm1513_vm3, %v1722_v45 }
 0x20c   : > { %3345 = vmatpush.xpose.msk.msra.mxu0 %vm1447_vm2, %v1677_v63 }
 0x20d   : > { %v1558_v1 = vpop.f32.mrf.mxu3 }
 0x20e   : > { %v1570_v2 = vmax.f32 %v1558_v1, 0.0 }
 0x20f   : > { %v1715_v47 = vpop.f32.mrf.mxu2 }
 0x210   : > { %2100 = vmatpush.msrb.mxu0 %v1444_v0  ;;  %3344 = vmatmul.msk.f32.vlgmr.msrb.gmra.mxu1 %vm1447_vm2, %v1570_v2  ;;  %v1723_v49 = vmax.f32 %v1715_v47, 0.0 }
 0x211   : > { %v1670_v4 = vpop.f32.mrf.mxu1 }
 0x212   : > { %v1678_v5 = vmax.f32 %v1670_v4, 0.0  ;;  %3332 = vmatmul.msk.f32.gmra.mxu3 %vm1513_vm3, %v1723_v49 }
 0x214   : > { %3347 = vmatpush.xpose.msk.msra.mxu1 %vm1447_vm2, %v1678_v5 }
 0x215   : > { %v1561_v9 = vpop.f32.mrf.mxu3 }
 0x216   : > { %v1571_v10 = vmax.f32 %v1561_v9, 0.0 }
 0x218   : > { %2123 = vmatpush.msrb.mxu1 %v1445_v8  ;;  %3346 = vmatmul.msk.f32.vlgmr.msra.gmra.mxu0 %vm1447_vm2, %v1571_v10 }
 0x21d   : > { %v1564_v11 = vpop.f32.mrf.mxu3 }
 0x21e   : > { %v1572_v12 = vmax.f32 %v1564_v11, 0.0 }
 0x220   : > { %3348 = vmatmul.msk.f32.vlgmr.msra.gmra.mxu1 %vm1447_vm2, %v1572_v12 }
 0x26a   : > { %v1808_v13 = vpop.f32.mrf.mxu0 }
 0x26b   : > { %v1994_v14 = vsel %vm1993_vm4, %v1808_v13, -inf }
 0x26c   : > { %1995 = vmax.xlane.f32.xlu0 %v1994_v14 }
 0x26d   : > { %v1761_v11 = vpop.f32.mrf.mxu3 }
 0x26e   : > { %v1779_v12 = vmax.f32 %v1761_v11, 0.0 }
 0x270   : > { %2146 = vmatpush.msra.mxu2 %v1779_v12 }
 0x272   : > { %v4494_v15 = vpop.f32.mrf.mxu1 }
 0x273   : > { %v1997_v16 = vsel %vm1993_vm4, %v4494_v15, -inf }
 0x274   : > { %1998 = vmax.xlane.f32.xlu2 %v1997_v16 }
 0x275   : > { %v1860_v17 = vpop.f32.mrf.mxu0 }
 0x276   : > { %v2016_v33 = vsel %vm1993_vm4, %v1860_v17, -inf }
 0x27d   : > { %v4500_v26 = vpop.f32.mrf.mxu1 }
 0x285   : > { %v1912_v27 = vpop.f32.mrf.mxu0 }
 0x286   : > { %v2022_v29 = vsel %vm1993_vm4, %v1912_v27, -inf }
 0x287   : > { %2023 = vmax.xlane.f32.xlu0 %v2022_v29 }
 0x28d   : > { %v1938_v31 = vpop.f32.mrf.mxu1 }
 0x28e   : > { %v2025_v32 = vsel %vm1993_vm4, %v1938_v31, -inf }
 0x28f   : > { %2026 = vmax.xlane.f32.xlu2 %v2025_v32  ;;  %2017 = vmax.xlane.f32.xlu0 %v2016_v33 }
 0x295   : > { %v1964_v34 = vpop.f32.mrf.mxu0 }
 0x296   : > { %v2028_v35 = vsel %vm1993_vm4, %v1964_v34, -inf }
 0x297   : > { %2029 = vmax.xlane.f32.xlu2 %v2028_v35  ;;  %v1764_v35 = vpop.f32.mrf.mxu3 }
 0x29d   : > { %v4507_v36 = vpop.f32.mrf.mxu1 }
 0x29e   : > { %v2031_v37 = vsel %vm1993_vm4, %v4507_v36, -inf }
 0x29f   : > { %2032 = vmax.xlane.f32.xlu0 %v2031_v37  ;;  %v1780_v37 = vmax.f32 %v1764_v35, 0.0  ;;  %v1767_v38 = vpop.f32.mrf.mxu3 }
 0x2a0   : > { %v1781_v41 = vmax.f32 %v1767_v38, 0.0 }
 0x2a1   : > { %v2485_v40 = vmul.f32 %v1780_v37, %v1780_v37  ;;  %2169 = vmatpush.msra.mxu3 %v1780_v37 }
 0x2a2   : > { %v2486_v43 = vmul.f32 %v1781_v41, %v1781_v41  ;;  %2192 = vmatpush.msra.mxu0 %v1781_v41 }
 0x2a3   : > { %v2491_v42 = vsel %vm1447_vm2, %v2485_v40, 0.0 }
 0x2a4   : > { %v2493_v45 = vsel %vm1447_vm2, %v2486_v43, 0.0 }
 0x2a7   : > { %v1770_v47 = vpop.f32.mrf.mxu3 }
 0x2df   : > { %v1996_v46 = vpop.xlane.xlu0 %1995 }
 0x2e0   : > { %v2000_v48 = vsub.f32 %v1808_v13, %v1996_v46 }
 0x2e2   : > { %v2002_v50 = vmul.f32 1.442695, %v2000_v48  ;;  %v1782_v48 = vmax.f32 %v1770_v47, 0.0 }
 0x2e4   : > { %3566 = vpow2.f32 %v2002_v50  ;;  %2215 = vmatpush.msra.mxu1 %v1782_v48  ;;  %v1773_v50 = vpop.f32.mrf.mxu3 }
 0x2e7   : > { %v1999_v53 = vpop.xlane.xlu2 %1998 }
 0x2e8   : > { %v2001_v63 = vsub.f32 %v4494_v15, %v1999_v53  ;;  %v2019_v15 = vsel %vm1993_vm4, %v4500_v26, -inf  ;;  %v1783_v53 = vmax.f32 %v1773_v50, 0.0 }
 0x2ea   : > { %v4516_v51 = vpop.eup %3566  ;;  %v2004_v5 = vmul.f32 1.442695, %v2001_v63  ;;  %2238 = vmatpush.msrb.mxu2 %v1783_v53  ;;  %v2487_v63 = vmul.f32 %v1782_v48, %v1782_v48 }
 0x2eb   : > { %v2006_v52 = vsel %vm1993_vm4, %v4516_v51, 0.0 }
 0x2ec   : > { %2007 = vadd.xlane.f32.xlu1 %v2006_v52 }
 0x2fa   : > { %v2024_v54 = vpop.xlane.xlu0 %2023 }
 0x2fb   : > { %v2036_v55 = vsub.f32 %v1912_v27, %v2024_v54 }
 0x2fd   : > { %v2044_v56 = vmul.f32 1.442695, %v2036_v55  ;;  %v2309_v55 = vld [vmem:[%s4878_s16 + $0x18] sm:$0xff]  ;;  %s4883_s16 = sld [smem:[#allocation42_spill]] }
 0x2ff   : > { %3568 = vpow2.f32 %v2044_v56  ;;  %v1776_v56 = vpop.f32.mrf.mxu3 }
 0x302   : > { %v2027_v57 = vpop.xlane.xlu2 %2026  ;;  %v2018_v58 = vpop.xlane.xlu0 %2017 }
 0x303   : > { %v2037_v59 = vsub.f32 %v1938_v31, %v2027_v57  ;;  %v2034_v60 = vsub.f32 %v1860_v17, %v2018_v58  ;;  %v1784_v57 = vmax.f32 %v1776_v56, 0.0  ;;  %v2308_v58 = vld [vmem:[%s4879_s7 + $0x10] sm:$0xff]  ;;  %s4884_s3 = smov %s4883_s16 }
 0x305   : > { %v4520_v62 = vpop.eup %3568  ;;  %v2046_v1 = vmul.f32 1.442695, %v2037_v59  ;;  %v2040_v2 = vmul.f32 1.442695, %v2034_v60  ;;  %v2307_v59 = vld [vmem:[%s4879_s7 + $0x8] sm:$0xff]  ;;  %2261 = vmatpush.msrb.mxu3 %v1784_v57  ;;  %v2306_v60 = vld [vmem:[%s4879_s7] sm:$0xff] }
 0x306   : > { %v2058_v4 = vsel %vm1993_vm4, %v4520_v62, 0.0 }
 0x307   : > { %3570 = vpow2.f32 %v2046_v1  ;;  %2059 = vadd.xlane.f32.xlu1 %v2058_v4  ;;  %v2488_v1 = vmul.f32 %v1783_v53, %v1783_v53  ;;  %v2489_v4 = vmul.f32 %v1784_v57, %v1784_v57 }
 0x308   : > { %3572 = vpow2.f32 %v2040_v2 }
 0x309   : > { %3574 = vpow2.f32 %v2004_v5  ;;  %v2496_v2 = vsel %vm1447_vm2, %v2488_v1, 0.0 }
 0x30a   : > { %v2030_v9 = vpop.xlane.xlu2 %2029 }
 0x30b   : > { %v2038_v10 = vsub.f32 %v1964_v34, %v2030_v9  ;;  %v2498_v9 = vsel %vm1447_vm2, %v2489_v4, 0.0  ;;  %v2346_v4 = vld [vmem:[%s4882_s1 + $0x8] sm:$0xff] }
 0x30d   : > { %v4525_v13 = vpop.eup %3570  ;;  %v2048_v14 = vmul.f32 1.442695, %v2038_v10 }
 0x30e   : > { %v4527_v16 = vpop.eup %3572  ;;  %v2061_v17 = vsel %vm1993_vm4, %v4525_v13, 0.0 }
 0x30f   : > { %3576 = vpow2.f32 %v2048_v14  ;;  %2020 = vmax.xlane.f32.xlu1 %v2019_v15  ;;  %v2052_v20 = vsel %vm1993_vm4, %v4527_v16, 0.0  ;;  %2062 = vadd.xlane.f32.xlu2 %v2061_v17  ;;  %v4535_v27 = vpop.eup %3574 }
 0x310   : > { %2053 = vadd.xlane.f32.xlu0 %v2052_v20  ;;  %v2009_v31 = vsel %vm1993_vm4, %v4535_v27, 0.0 }
 0x312   : > { %v2033_v25 = vpop.xlane.xlu0 %2032 }
 0x313   : > { %v2039_v28 = vsub.f32 %v4507_v36, %v2033_v25  ;;  %v2484_v36 = vmul.f32 %v1779_v12, %v1779_v12 }
 0x315   : > { %v4538_v29 = vpop.eup %3576  ;;  %v2050_v30 = vmul.f32 1.442695, %v2039_v28  ;;  %v2490_v39 = vsel %vm1447_vm2, %v2484_v36, 0.0  ;;  %v2524_v28 = vld [vmem:[%s4880_s10] sm:$0x3f]  ;;  %s4823_s10 = sand.u32 1, %s3934_s11  }
 0x316   : > { %v2064_v32 = vsel %vm1993_vm4, %v4538_v29, 0.0  ;;  %v2492_v44 = vadd.f32 %v2491_v42, %v2490_v39  ;;  %s3271_s4 = sshll.u32 %s4823_s10, 4  ;;  %s4885_s10 = smul.u32 24, %s4901_s26 }
 0x317   : > { %3578 = vpow2.f32 %v2050_v30  ;;  %2010 = vadd.xlane.f32.xlu1 %v2009_v31  ;;  %2065 = vadd.xlane.f32.xlu2 %v2064_v32  ;;  %s4624_s5 = scalar_lea.vmem [#allocation18], %s3271_s4  ;;  %s4886_s26 = sld [smem:[#allocation43_spill]] }
 0x318   : > { %v4551_v46 = vadd.f32 %v2493_v45, %v2492_v44  ;;  %s4636_s6 = scalar_lea.vmem %s4154_s27, %s4885_s10 }
 0x31a   : > { %vm2507_vm5 = vcmp.eq.f32.partialorder %v4551_v46, inf  ;;  %v2510_v56 = vand.u32 2147483648, %v4551_v46  ;;  %vm2509_vm6 = vcmp.eq.f32.partialorder %v4551_v46, 0.0 }
 0x31d   : > { %v4544_v33 = vpop.eup %3578 }
 0x31e   : > { %v2067_v34 = vsel %vm1993_vm4, %v4544_v33, 0.0 }
 0x31f   : > { %2068 = vadd.xlane.f32.xlu0 %v2067_v34 }
 0x35f   : > { %v2008_v49 = vpop.xlane.xlu1 %2007 }
 0x360   : > { %3580 = vrcp.f32 %v2008_v49 }
 0x361   : > { %3582 = vrsqrt.f32 %v4551_v46 }
 0x366   : > { %v3581_v52 = vpop.eup %3580 }
 0x367   : > { %v4554_v54 = vmul.f32 %v3581_v52, %v4516_v51  ;;  %v2495_v51 = vsel %vm1447_vm2, %v2487_v63, 0.0  ;;  %v3583_v12 = vpop.eup %3582 }
 0x368   : > { %v2497_v5 = vadd.f32 %v2496_v2, %v2495_v51  ;;  %v2501_v14 = vmul.f32 %v3583_v12, %v4551_v46  ;;  %v2348_v51 = vld [vmem:[%s4881_s14 + $0x18] sm:$0xff]  ;;  %v2347_v2 = vld [vmem:[%s4882_s1 + $0x10] sm:$0xff]  ;;  %s2991_s14 = sshll.u32 %s4624_s5, 4  ;;  %s2992_s14 = int_to_ptr.vmem [resolvable:$true] %s2991_s14 }
 0x369   : > { %3349 = vmatmul.msk.f32.vlgmr.msrb.gmra.mxu0 %vm1993_vm4, %v4554_v54 }
 0x36a   : > { %2332 = vmatpush.msrb.mxu0 %v2309_v55  ;;  %v4566_v10 = vadd.f32 %v2498_v9, %v2497_v5  ;;  %v2502_v34 = vmul.f32 %v3583_v12, %v2501_v14  ;;  %v2345_v5 = vld [vmem:[%s4882_s1] sm:$0xff]  ;;  %v2564_v9 = vld [vmem:[%s4883_s16 + $0x8] sm:$0xff]  ;;  %s3386_s16 = sshll.u32 %s4180_s0, 4 }
 0x36b   : > { %s2990_s10 = scalar_lea.hbm %s4144_s25, %s3386_s16 }
 0x36c   : > { %2333 = vmatpush.msrb.mxu0 %v2308_v58  ;;  %vm2519_vm7 = vcmp.eq.f32.partialorder %v4566_v10, inf  ;;  %vm2521_vm8 = vcmp.eq.f32.partialorder %v4566_v10, 0.0 }
 0x36e   : > { %2334 = vmatpush.msrb.mxu0 %v2307_v59  ;;  %v2522_v59 = vand.u32 2147483648, %v4566_v10 }
 0x370   : > { %2335 = vmatpush.msrb.mxu0 %v2306_v60 }
 0x37a   : > { %v2060_v11 = vpop.xlane.xlu1 %2059 }
 0x37b   : > { %3584 = vrcp.f32 %v2060_v11 }
 0x37c   : > { %3586 = vrsqrt.f32 %v4566_v10 }
 0x381   : > { %v3585_v15 = vpop.eup %3584 }
 0x382   : > { %v4571_v17 = vmul.f32 %v3585_v15, %v4520_v62  ;;  %v2021_v20 = vpop.xlane.xlu1 %2020  ;;  %v2063_v25 = vpop.xlane.xlu2 %2062  ;;  %v2503_v62 = vmul.f32 0.5, %v2502_v34  ;;  %v3562_v15 = vld [vmem:[#allocation15] ss:$0 sm:$0xff] }
 0x383   : > { %v3587_v30 = vpop.eup %3586  ;;  %v2035_v31 = vsub.f32 %v4500_v26, %v2021_v20  ;;  %v2054_v32 = vpop.xlane.xlu0 %2053  ;;  %v3985_v20 = vmov 0  }
 0x384   : > { %3588 = vrcp.f32 %v2054_v32  ;;  %3353 = vmatmul.msk.f32.vlgmr.msra.gmra.mxu0 %vm1993_vm4, %v4571_v17  ;;  %v2513_v36 = vmul.f32 %v3587_v30, %v4566_v10  ;;  %v2504_v42 = vsub.f32 1.5, %v2503_v62  ;;  %3553 = vset.pattern.permute.xlu1 %v3985_v20 }
 0x385   : > { %v2042_v35 = vmul.f32 1.442695, %v2035_v31  ;;  %3365 = vmatpush.msk.msra.mxu0 %vm1466_vm1, %v2524_v28  ;;  %3590 = vrcp.f32 %v2063_v25  ;;  %3554 = vset.pattern.permute.xlu2 %v3985_v20 }
 0x386   : > { %v2514_v40 = vmul.f32 %v3587_v30, %v2513_v36  ;;  %v2505_v47 = vmul.f32 %v3583_v12, %v2504_v42  ;;  %3555 = vset.pattern.permute.xlu0 %v3985_v20  ;;  %v3564_v20 = vld [vmem:[#allocation2] ss:$0 sm:$0xff] }
 0x387   : > { %3592 = vpow2.f32 %v2042_v35 }
 0x388   : > { %v2515_v45 = vmul.f32 0.5, %v2514_v40 }
 0x38a   : > { %v3589_v37 = vpop.eup %3588  ;;  %v2011_v38 = vpop.xlane.xlu1 %2010 }
 0x38b   : > { %v2066_v39 = vpop.xlane.xlu2 %2065  ;;  %v4580_v26 = vmul.f32 %v3589_v37, %v4527_v16  ;;  %3594 = vrcp.f32 %v2011_v38  ;;  %v3591_v41 = vpop.eup %3590 }
 0x38c   : > { %3596 = vrcp.f32 %v2066_v39  ;;  %3357 = vmatmul.msk.f32.vlgmr.msrb.gmra.mxu0 %vm1231_vm0, %v1444_v0  ;;  %v2079_v16 = vmul.f32 %v3591_v41, %v4525_v13  ;;  %v2516_v0 = vsub.f32 1.5, %v2515_v45  ;;  %v2506_v13 = vmul.f32 %v2505_v47, %v4551_v46 }
 0x38d   : > { %v4585_v43 = vpop.eup %3592  ;;  %3351 = vmatmul.msk.f32.vlgmr.msra.gmra.mxu2 %vm1993_vm4, %v4580_v26 }
 0x38e   : > { %v2055_v44 = vsel %vm1993_vm4, %v4585_v43, 0.0  ;;  %v2601_v50 = vmul.f32 %v2079_v16, %v2079_v16  ;;  %v2508_v3 = vsel %vm2507_vm5, %v4551_v46, %v2506_v13 }
 0x38f   : > { %2056 = vadd.xlane.f32.xlu1 %v2055_v44  ;;  %v2511_v58 = vsel %vm2509_vm6, %v2510_v56, %v2508_v3  ;;  %v3618_v3 = vld [vmem:[%s4345_s15] sm:$0xff] }
 0x390   : > { %v2609_v55 = vsel %vm1993_vm4, %v2601_v50, 0.0 }
 0x391   : > { %v3595_v48 = vpop.eup %3594 }
 0x392   : > { %v3597_v49 = vpop.eup %3596  ;;  %v4593_v61 = vmul.f32 %v3595_v48, %v4535_v27  ;;  %v2517_v27 = vmul.f32 %v3587_v30, %v2516_v0  ;;  %v2069_v14 = vpop.xlane.xlu0 %2068  ;;  %v2598_v30 = vmul.f32 %v4580_v26, %v4580_v26 }
 0x393   : > { %v2080_v52 = vmul.f32 %v3597_v49, %v4538_v29 }
 0x394   : > { %3350 = vmatmul.msk.f32.vlgmr.msrb.gmra.mxu1 %vm1993_vm4, %v4593_v61  ;;  %3358 = vmatmul.msk.f32.gmra.mxu0 %vm1231_vm0, %v1445_v8  ;;  %v2518_v8 = vmul.f32 %v2517_v27, %v4566_v10  ;;  %v2604_v36 = vsel %vm1993_vm4, %v2598_v30, 0.0  ;;  %v2816_v27 = vld [vmem:[%s4886_s26 + $0x10] sm:$0xff] }
 0x395   : > { %v2602_v53 = vmul.f32 %v2080_v52, %v2080_v52  ;;  %3355 = vmatmul.msk.f32.vlgmr.msrb.gmra.mxu2 %vm1993_vm4, %v2080_v52  ;;  %2367 = vmatpush.msrb.mxu1 %v2348_v51 }
 0x396   : > { %v2520_v60 = vsel %vm2519_vm7, %v4566_v10, %v2518_v8  ;;  %v2563_v10 = vld [vmem:[%s4884_s3] sm:$0xff] }
 0x397   : > { %v2610_v29 = vsel %vm1993_vm4, %v2602_v53, 0.0  ;;  %v2523_v63 = vsel %vm2521_vm8, %v2522_v59, %v2520_v60  ;;  %2368 = vmatpush.msrb.mxu1 %v2347_v2 }
 0x398   : > { %v4607_v57 = vadd.f32 %v2610_v29, %v2609_v55  ;;  %v2815_v55 = vld [vmem:[%s4886_s26 + $0x8] sm:$0xff]  ;;  %v2814_v29 = vld [vmem:[%s4886_s26] sm:$0xff] }
 0x399   : > { %2369 = vmatpush.msrb.mxu1 %v2346_v4 }
 0x39b   : > { %2370 = vmatpush.msrb.mxu1 %v2345_v5 }
 0x39c   : > { %3354 = vmatmul.msk.f32.vlgmr.msra.gmra.mxu1 %vm1993_vm4, %v2079_v16  ;;  %3366 = vmatmul.msk.f32.vlgmr.msra.gmra.mxu0 %vm1447_vm2, %v2511_v58 }
 0x39d   : > { %2589 = vmatpush.msra.mxu1 %v2564_v9 }
 0x39f   : > { %2590 = vmatpush.msra.mxu1 %v2563_v10  ;;  %v3619_v10 = vld [vmem:[%s4345_s15 + $0x8] sm:$0xff] }
 0x3a4   : > { %3367 = vmatmul.msk.f32.gmra.mxu0 %vm1447_vm2, %v2523_v63 }
 0x3e6   : > { %v2102_v46 = vpop.f32.mrf.mxu0 }
 0x3e7   : > { %v2951_v1 = vadd.f32 %v2102_v46, %v4350_v6 }
 0x3e9   : > { %2953 = vst.msk [vmem:[%s4624_s5] sm:$0xff] %vm1231_vm0, %v2951_v1 }
 0x401   : > { %v4638_v6 = vpop.f32.mrf.mxu0 }
 0x402   : > { %v2957_v11 = vadd.f32 %v4638_v6, %v4396_v21  ;;  %v2057_v12 = vpop.xlane.xlu1 %2056  ;;  %v2600_v21 = vmul.f32 %v4571_v17, %v4571_v17  ;;  %v2268_v59 = vmul.f32 %v4638_v6, %v4638_v6 }
 0x403   : > { %3598 = vrcp.f32 %v2057_v12 }
 0x404   : > { %2963 = vst.msk [vmem:[%s4636_s6 + $0x10] sm:$0xff] %vm1447_vm2, %v2957_v11  ;;  %3600 = vrcp.f32 %v2069_v14  ;;  %v2607_v39 = vsel %vm1993_vm4, %v2600_v21, 0.0  ;;  %v2275_v5 = vsel %vm1447_vm2, %v2268_v59, 0.0 }
 0x409   : > { %v3599_v25 = vpop.eup %3598  ;;  %v2337_v28 = vpop.f32.mrf.mxu0 }
 0x40a   : > { %v2077_v31 = vmul.f32 %v3599_v25, %v4585_v43  ;;  %v2338_v32 = vadd.f32 %v3562_v15, %v2337_v28  ;;  %v3601_v37 = vpop.eup %3600 }
 0x40b   : > { %v4658_v43 = vmul.f32 %v3601_v37, %v4544_v33 }
 0x40c   : > { %v2599_v34 = vmul.f32 %v2077_v31, %v2077_v31  ;;  %v2343_v35 = vmax.f32 %v2338_v32, 0.0  ;;  %3352 = vmatmul.msk.f32.vlgmr.msra.gmra.mxu3 %vm1993_vm4, %v2077_v31 }
 0x40d   : > { %v2603_v32 = vmul.f32 %v4658_v43, %v4658_v43 }
 0x40e   : > { %v2605_v62 = vsel %vm1993_vm4, %v2599_v34, 0.0  ;;  %3359 = vmatmul.msk.f32.vlgmr.msrb.gmra.mxu1 %vm1231_vm0, %v2343_v35 }
 0x40f   : > { %v2606_v38 = vadd.f32 %v2605_v62, %v2604_v36  ;;  %v2612_v35 = vsel %vm1993_vm4, %v2603_v32, 0.0 }
 0x410   : > { %v2148_v40 = vpop.f32.mrf.mxu2 }
 0x411   : > { %v4654_v26 = vadd.f32 %v2607_v39, %v2606_v38  ;;  %v2955_v17 = vadd.f32 %v2148_v40, %v4383_v18  ;;  %v2125_v41 = vpop.f32.mrf.mxu1  ;;  %v2340_v42 = vpop.f32.mrf.mxu0  ;;  %v3563_v18 = vld [vmem:[#allocation16] ss:$0 sm:$0xff]  ;;  %v2266_v8 = vmul.f32 %v2148_v40, %v2148_v40  ;;  %v2613_v39 = vadd.f32 %v2612_v35, %v4607_v57 }
 0x412   : > { %v2952_v44 = vadd.f32 %v2125_v41, %v4353_v7  ;;  %v2341_v45 = vadd.f32 %v3562_v15, %v2340_v42 }
 0x413   : > { %2961 = vst.msk [vmem:[%s4636_s6] sm:$0xff] %vm1447_vm2, %v2955_v17  ;;  %v2272_v46 = vsel %vm1447_vm2, %v2266_v8, 0.0  ;;  %vm2621_vm13 = vcmp.eq.f32.partialorder %v4654_v26, inf  ;;  %vm2623_vm14 = vcmp.eq.f32.partialorder %v4654_v26, 0.0  ;;  %vm2633_vm15 = vcmp.eq.f32.partialorder %v2613_v39, inf }
 0x414   : > { %2954 = vst.msk [vmem:[%s4624_s5 + $0x8] sm:$0xff] %vm1231_vm0, %v2952_v44  ;;  %v2344_v16 = vmax.f32 %v2341_v45, 0.0  ;;  %3356 = vmatmul.msk.f32.vlgmr.msrb.gmra.mxu3 %vm1993_vm4, %v4658_v43 }
 0x416   : > { %3360 = vmatmul.msk.f32.gmra.mxu1 %vm1231_vm0, %v2344_v16 }
 0x418   : > { %v2240_v47 = vpop.f32.mrf.mxu2 }
 0x419   : > { %v2217_v33 = vpop.f32.mrf.mxu1  ;;  %v2959_v48 = vadd.f32 %v2240_v47, %v4408_v23  ;;  %v2555_v7 = vpop.f32.mrf.mxu0  ;;  %v2817_v23 = vld [vmem:[%s4886_s26 + $0x18] sm:$0xff]  ;;  %v2270_v9 = vmul.f32 %v2240_v47, %v2240_v47 }
 0x41a   : > { %v2958_v49 = vadd.f32 %v2217_v33, %v4402_v22  ;;  %v2556_v0 = vadd.f32 %v3563_v18, %v2555_v7  ;;  %2863 = vmatpush.msrb.mxu1 %v2817_v23  ;;  %v2818_v22 = vld [vmem:[%s4139_s13] sm:$0x3f]  ;;  %v2269_v1 = vmul.f32 %v2217_v33, %v2217_v33 }
 0x41b   : > { %2965 = vst.msk [vmem:[%s4636_s6 + $0x20] sm:$0xff] %vm1447_vm2, %v2959_v48  ;;  %3374 = vmatpush.msk.msrb.mxu0 %vm1466_vm1, %v2818_v22  ;;  %v2278_v12 = vsel %vm1447_vm2, %v2270_v9, 0.0 }
 0x41c   : > { %2964 = vst.msk [vmem:[%s4636_s6 + $0x18] sm:$0xff] %vm1447_vm2, %v2958_v49  ;;  %v2561_v50 = vmax.f32 %v2556_v0, 0.0  ;;  %2864 = vmatpush.msrb.mxu1 %v2816_v27  ;;  %v2277_v6 = vsel %vm1447_vm2, %v2269_v1, 0.0 }
 0x41d   : > { %v2279_v25 = vadd.f32 %v2278_v12, %v2277_v6 }
 0x41e   : > { %3368 = vmatmul.msk.f32.vlgmr.msra.gmra.mxu1 %vm1513_vm3, %v2561_v50 }
 0x41f   : > { %2865 = vmatpush.msrb.mxu1 %v2815_v55 }
 0x421   : > { %v2558_v52 = vpop.f32.mrf.mxu0  ;;  %2866 = vmatpush.msrb.mxu1 %v2814_v29 }
 0x422   : > { %v2559_v13 = vadd.f32 %v3563_v18, %v2558_v52 }
 0x424   : > { %v2562_v53 = vmax.f32 %v2559_v13, 0.0 }
 0x426   : > { %3369 = vmatmul.msk.f32.gmra.mxu1 %vm1513_vm3, %v2562_v53 }
 0x42e   : > { %3377 = vmatmul.msk.f32.vlgmr.msrb.gmra.mxu1 %vm1231_vm0, %v3618_v3 }
 0x436   : > { %3378 = vmatmul.msk.f32.gmra.mxu1 %vm1231_vm0, %v3619_v10  ;;  %vm2635_vm0 = vcmp.eq.f32.partialorder %v2613_v39, 0.0 }
 0x48b   : > { %v4682_v56 = vpop.f32.mrf.mxu1 }
 0x48c   : > { %2380 = vperm.xlu1 %3553, %v4682_v56  }
 0x48f   : > { %v2171_v58 = vpop.f32.mrf.mxu3 }
 0x490   : > { %v2267_v60 = vmul.f32 %v2171_v58, %v2171_v58  ;;  %v2956_v63 = vadd.f32 %v2171_v58, %v4389_v19 }
 0x492   : > { %v2273_v51 = vsel %vm1447_vm2, %v2267_v60, 0.0  ;;  %2962 = vst.msk [vmem:[%s4636_s6 + $0x8] sm:$0xff] %vm1447_vm2, %v2956_v63  ;;  %v2624_v60 = vand.u32 2147483648, %v4654_v26 }
 0x493   : > { %v2274_v2 = vadd.f32 %v2273_v51, %v2272_v46  ;;  %v4694_v4 = vpop.f32.mrf.mxu1 }
 0x494   : > { %2385 = vperm.xlu2 %3554, %v4694_v4  }
 0x495   : > { %v2276_v19 = vadd.f32 %v2275_v5, %v2274_v2  ;;  %v2636_v2 = vand.u32 2147483648, %v2613_v39 }
 0x497   : > { %v2263_v11 = vpop.f32.mrf.mxu3  ;;  %3602 = vrsqrt.f32 %v2276_v19  ;;  %vm2289_vm9 = vcmp.eq.f32.partialorder %v2276_v19, inf  ;;  %v2292_v47 = vand.u32 2147483648, %v2276_v19  ;;  %vm2291_vm10 = vcmp.eq.f32.partialorder %v2276_v19, 0.0 }
 0x498   : > { %v2271_v14 = vmul.f32 %v2263_v11, %v2263_v11  ;;  %v2960_v15 = vadd.f32 %v2263_v11, %v4414_v24  ;;  %3604 = vrsqrt.f32 %v4654_v26 }
 0x49a   : > { %v2280_v28 = vsel %vm1447_vm2, %v2271_v14, 0.0  ;;  %2966 = vst.msk [vmem:[%s4636_s6 + $0x28] sm:$0xff] %vm1447_vm2, %v2960_v15  ;;  %s4887_s6 = sld [smem:[#allocation26_spill]] }
 0x49b   : > { %v2281_v30 = vadd.f32 %v2280_v28, %v2279_v25  ;;  %v2592_v31 = vpop.f32.mrf.mxu1 }
 0x49c   : > { %v4708_v21 = vadd.f32 %v3564_v20, %v2592_v31 }
 0x49d   : > { %v3603_v34 = vpop.eup %3602  ;;  %3606 = vrsqrt.f32 %v2281_v30  ;;  %vm2301_vm11 = vcmp.eq.f32.partialorder %v2281_v30, inf  ;;  %v2304_v23 = vand.u32 2147483648, %v2281_v30  ;;  %vm2303_vm12 = vcmp.eq.f32.partialorder %v2281_v30, 0.0 }
 0x49e   : > { %2640 = vperm.xlu0 %3555, %v4708_v21   ;;  %v2283_v24 = vmul.f32 %v3603_v34, %v2276_v19  ;;  %v3605_v62 = vpop.eup %3604  ;;  %3608 = vrsqrt.f32 %v2613_v39 }
 0x49f   : > { %v2615_v43 = vmul.f32 %v3605_v62, %v4654_v26 }
 0x4a0   : > { %v2284_v36 = vmul.f32 %v3603_v34, %v2283_v24  ;;  %s1190_s15 = scalar_lea.vmem %s4887_s6, %s4339_s2  ;;  %s2993_s6 = sshll.u32 %s2990_s10, 4  ;;  %s2994_s6 = int_to_ptr.hbm [resolvable:$true] %s2993_s6 }
 0x4a1   : > { %v2616_v33 = vmul.f32 %v3605_v62, %v2615_v43  ;;  %v4727_v9 = vld [vmem:[%s1190_s15 + $0x8] sm:$0xff]  ;;  %s3874_s3 = sshra.s32 %s2994_s6, 4  ;;  %s3875_s3 = int_to_ptr.hbm [resolvable:$true] %s3874_s3 }
 0x4a2   : > { %v2285_v37 = vmul.f32 0.5, %v2284_v36  ;;  %s3876_s7 = scalar_lea.hbm %s3875_s3, 16  ;;  %p3881_p13 = scmp.lt.s32.totalorder %s3875_s3, %s4144_s25 }
 0x4a3   : > { %v3607_v38 = vpop.eup %3606  ;;  %v2595_v40 = vpop.f32.mrf.mxu1  ;;  %v2617_v50 = vmul.f32 0.5, %v2616_v33  ;;  %p3877_p9 = scmp.ne.s32.totalorder %s3875_s3, %s3876_s7  ;;  %p3882_p1 = scmp.lt.s32.totalorder %s3880_s8, %s3876_s7 }
 0x4a4   : > { %v4714_v17 = vadd.f32 %v3564_v20, %v2595_v40  ;;  %v2286_v41 = vsub.f32 1.5, %v2285_v37  ;;  %v2295_v42 = vmul.f32 %v3607_v38, %v2281_v30  ;;  %v3609_v0 = vpop.eup %3608  ;;  %v3565_v20 = vld [vmem:[#allocation3] ss:$0 sm:$0xff] }
 0x4a5   : > { %v2627_v53 = vmul.f32 %v3609_v0, %v2613_v39  ;;  %v2618_v27 = vsub.f32 1.5, %v2617_v50  ;;  %p3878_p12 = pnand %p3877_p9, %p4197_p5  ;;  %p3883_p2 = por %p3882_p1, %p3881_p13 }
 0x4a6   : > { %2645 = vperm.xlu2 %3554, %v4714_v17   ;;  %v2287_v44 = vmul.f32 %v3603_v34, %v2286_v41  ;;  %v2296_v45 = vmul.f32 %v3607_v38, %v2295_v42 }
 0x4a7   : > { %v2628_v22 = vmul.f32 %v3609_v0, %v2627_v53  ;;  %v2619_v29 = vmul.f32 %v3605_v62, %v2618_v27  ;;  %p3879_p0 = pneg %p3878_p12 }
 0x4a8   : > { %v2288_v16 = vmul.f32 %v2287_v44, %v2276_v19  ;;  %v2297_v18 = vmul.f32 0.5, %v2296_v45 }
 0x4a9   : > { %v2629_v3 = vmul.f32 0.5, %v2628_v22  ;;  %v2620_v8 = vmul.f32 %v2619_v29, %v4654_v26  ;;  %p3884_p3 = pnand %p3883_p2, %p3879_p0 }
 0x4aa   : > { %v2290_v48 = vsel %vm2289_vm9, %v2276_v19, %v2288_v16  ;;  %v2298_v57 = vsub.f32 1.5, %v2297_v18 }
 0x4ab   : > { %v2293_v7 = vsel %vm2291_vm10, %v2292_v47, %v2290_v48  ;;  %v2630_v58 = vsub.f32 1.5, %v2629_v3  ;;  %v2622_v59 = vsel %vm2621_vm13, %v4654_v26, %v2620_v8  ;;  %v4735_v26 = vld [vmem:[%s1190_s15] sm:$0xff]  ;;  %v2868_v15 = vpop.f32.mrf.mxu1  ;;  %s4889_s15 = sand.u32 1, %s3934_s11  }
 0x4ac   : > { %3375 = vmatmul.msk.f32.vlgmr.msrb.gmra.mxu0 %vm1447_vm2, %v2293_v7  ;;  %v2299_v49 = vmul.f32 %v3607_v38, %v2298_v57  ;;  %v2625_v63 = vsel %vm2623_vm14, %v2624_v60, %v2622_v59  ;;  %s2968_s1 = scalar_lea.sflag [#allocation6], %s4889_s15 }
 0x4ad   : > { %v2631_v46 = vmul.f32 %v3609_v0, %v2630_v58 }
 0x4ae   : > { %v2300_v52 = vmul.f32 %v2299_v49, %v2281_v30 }
 0x4af   : > { %v2632_v1 = vmul.f32 %v2631_v46, %v2613_v39 }
 0x4b0   : > { %v2302_v13 = vsel %vm2301_vm11, %v2281_v30, %v2300_v52 }
 0x4b1   : > { %v2305_v55 = vsel %vm2303_vm12, %v2304_v23, %v2302_v13  ;;  %v2634_v51 = vsel %vm2633_vm15, %v2613_v39, %v2632_v1 }
 0x4b2   : > { %v2637_v5 = vsel %vm2635_vm0, %v2636_v2, %v2634_v51 }
 0x4b3   : > { %v2871_v31 = vpop.f32.mrf.mxu1 }
 0x4b4   : > { %3376 = vmatmul.msk.f32.gmra.mxu0 %vm1447_vm2, %v2305_v55 }
 0x4c1   : > { %2650 = vxpose.xlu1.b32.start.end [1/1] (short) (narrow) %v2625_v63, 8 }
 0x4cc   : > { %2705 = vxpose.xlu2.b32.start.end [1/1] (short) (narrow) %v2637_v5, 8 }
 0x4ee   : > { %v2386_v10 = vpop.permute.xlu2 %2385 }
 0x4ef   : > { %v2389_v19 = vmul.f32 %v2386_v10, %v4727_v9 }
 0x4f1   : > { %2425 = vmatpush.msra.mxu3 %v2389_v19 }
 0x4f2   : > { %3362 = vmatmul.msk.f32.vlgmr.msra.gmra.mxu3 %vm1993_vm4, %v4593_v61 }
 0x4f3   : > { %2465 = vmatpush.msrb.mxu3 %v4694_v4 }
 0x4fa   : > { %3364 = vmatmul.msk.f32.vlgmr.msrb.gmra.mxu3 %vm1993_vm4, %v4593_v61 }
 0x4fe   : > { %v2381_v6 = vpop.permute.xlu1 %2380 }
 0x4ff   : > { %v2388_v11 = vmul.f32 %v2381_v6, %v4735_v26 }
 0x500   : > { %v2646_v12 = vpop.permute.xlu2 %2645 }
 0x501   : > { %v2649_v14 = vmul.f32 %v2646_v12, %v4727_v9  ;;  %2405 = vmatpush.msra.mxu2 %v2388_v11 }
 0x502   : > { %3361 = vmatmul.msk.f32.vlgmr.msra.gmra.mxu2 %vm1993_vm4, %v4554_v54 }
 0x503   : > { %2445 = vmatpush.msrb.mxu2 %v4682_v56  ;;  %2755 = vmatpush.msra.mxu3 %v2649_v14 }
 0x505   : > { %2795 = vmatpush.msrb.mxu3 %v4714_v17 }
 0x50a   : > { %3363 = vmatmul.msk.f32.vlgmr.msrb.gmra.mxu2 %vm1993_vm4, %v4554_v54 }
 0x510   : > { %v2641_v61 = vpop.permute.xlu0 %2640 }
 0x511   : > { %v2648_v4 = vmul.f32 %v2641_v61, %v4735_v26 }
 0x513   : > { %2700 = vmatpush.msra.mxu2 %v2648_v4 }
 0x515   : > { %2775 = vmatpush.msrb.mxu2 %v4708_v21 }
 0x529   : > { %v2845_v25 = vpop.f32.mrf.mxu0 }
 0x52a   : > { %v2869_v28 = vadd.f32 %v2868_v15, %v2845_v25 }
 0x52c   : > { %v2878_v30 = vadd.f32 %v3565_v20, %v2869_v28 }
 0x52e   : > { %v3379_v33 = vmul.f32 -1.442695, %v2878_v30 }
 0x531   : > { %v2848_v32 = vpop.f32.mrf.mxu0 }
 0x532   : > { %v2872_v56 = vadd.f32 %v2871_v31, %v2848_v32 }
 0x534   : > { %v2879_v34 = vadd.f32 %v3565_v20, %v2872_v56 }
 0x536   : > { %v3380_v24 = vmul.f32 -1.442695, %v2879_v34 }
 0x538   : > { %3610 = vpow2.f32 %v3380_v24 }
 0x53e   : > { %v3611_v35 = vpop.eup %3610 }
 0x53f   : > { %v2887_v36 = vadd.f32 1.0, %v3611_v35 }
 0x541   : > { %3612 = vrcp.f32 %v2887_v36  ;;  %v2914_v38 = vand.u32 2147483648, %v2887_v36  ;;  %v2912_v21 = vand.u32 2147483647, %v2887_v36  ;;  %vm2908_vm2 = vweird.f32 %v2887_v36 }
 0x542   : > { %3614 = vpow2.f32 %v3379_v33 }
 0x543   : > { %v2915_v17 = vor.u32 1.1754944e-38, %v2914_v38  ;;  %vm2913_vm5 = vcmp.eq.f32.partialorder %v2912_v21, 8.507059e+37 }
 0x547   : > { %v3613_v54 = vpop.eup %3612 }
 0x548   : > { %v2904_v62 = vmul.f32 %v3613_v54, %v2887_v36  ;;  %vm2909_vm1 = vweird.f32 %v3613_v54  ;;  %v3615_v48 = vpop.eup %3614 }
 0x549   : > { %vm2910_vm3 = vmor %vm2908_vm2, %vm2909_vm1  ;;  %v2886_v57 = vadd.f32 1.0, %v3615_v48 }
 0x54a   : > { %v2905_v37 = vsub.f32 1.0, %v2904_v62 }
 0x54b   : > { %3616 = vrcp.f32 %v2886_v57  ;;  %v2899_v55 = vand.u32 2147483648, %v2886_v57  ;;  %vm2893_vm6 = vweird.f32 %v2886_v57  ;;  %v2897_v22 = vand.u32 2147483647, %v2886_v57 }
 0x54c   : > { %v2906_v39 = vmul.f32 %v3613_v54, %v2905_v37 }
 0x54d   : > { %v2900_v3 = vor.u32 1.1754944e-38, %v2899_v55  ;;  %vm2898_vm8 = vcmp.eq.f32.partialorder %v2897_v22, 8.507059e+37 }
 0x54e   : > { %v2907_v40 = vadd.f32 %v3613_v54, %v2906_v39 }
 0x550   : > { %v2911_v41 = vsel %vm2910_vm3, %v3613_v54, %v2907_v40 }
 0x551   : > { %v4747_v42 = vsel %vm2913_vm5, %v2915_v17, %v2911_v41  ;;  %v3617_v7 = vpop.eup %3616 }
 0x552   : > { %2925 = vperm.xlu1 %3553, %v4747_v42   ;;  %v2889_v49 = vmul.f32 %v3617_v7, %v2886_v57 }
 0x554   : > { %v2890_v52 = vsub.f32 1.0, %v2889_v49 }
 0x556   : > { %v2891_v13 = vmul.f32 %v3617_v7, %v2890_v52 }
 0x558   : > { %v2892_v27 = vadd.f32 %v3617_v7, %v2891_v13 }
 0x565   : > { %v2666_v43 = vpop.trf.xlu1  ;;  %v2721_v44 = vpop.trf.xlu2 }
 0x566   : > { %3370 = vmatmul.msk.f32.vlgmr.msra.gmra.mxu2 %vm1993_vm4, %v2666_v43  ;;  %3371 = vmatmul.msk.f32.vlgmr.msra.gmra.mxu3 %vm1993_vm4, %v2721_v44 }
 0x56e   : > { %3372 = vmatmul.msk.f32.vlgmr.msrb.gmra.mxu2 %vm1993_vm4, %v2666_v43  ;;  %3373 = vmatmul.msk.f32.vlgmr.msrb.gmra.mxu3 %vm1993_vm4, %v2721_v44  ;;  %vm2894_vm4 = vweird.f32 %v3617_v7 }
 0x56f   : > { %vm2895_vm7 = vmor %vm2893_vm6, %vm2894_vm4 }
 0x570   : > { %v2896_v29 = vsel %vm2895_vm7, %v3617_v7, %v2892_v27 }
 0x571   : > { %v2901_v8 = vsel %vm2898_vm8, %v2900_v3, %v2896_v29 }
 0x572   : > { %v2932_v58 = vsub.f32 1.0, %v2901_v8 }
 0x575   : > { %v4756_v16 = vpop.f32.mrf.mxu3 }
 0x57d   : > { %v2467_v47 = vpop.f32.mrf.mxu3 }
 0x585   : > { %v4754_v45 = vpop.f32.mrf.mxu2 }
 0x58d   : > { %v2447_v18 = vpop.f32.mrf.mxu2 }
 0x58e   : > { %2472 = vperm.xlu0 %3555, %v2447_v18  }
 0x596   : > { %2477 = vperm.xlu0 %3555, %v2467_v47  }
 0x5e9   : > { %v2702_v0 = vpop.f32.mrf.mxu2  ;;  %v4758_v50 = vpop.f32.mrf.mxu3 }
 0x5f1   : > { %v2777_v53 = vpop.f32.mrf.mxu2  ;;  %v2797_v23 = vpop.f32.mrf.mxu3 }
 0x5f2   : > { %2802 = vperm.xlu0 %3555, %v2777_v53   ;;  %2807 = vperm.xlu2 %3554, %v2797_v23  }
 0x5fa   : > { %2920 = vperm.xlu0 %3555, %v2901_v8  }
 0x602   : > { %2936 = vperm.xlu0 %3555, %v2932_v58  }
 0x603   : > { %3887 = shalt.err (!%p3884_p3)
}
 0x604   : > { %s3986_s5 = smov 128   ;;  %s3987_s0 = smov 8   ;;  %v2933_v59 = vsub.f32 1.0, %v4747_v42  ;;  %v2473_v60 = vpop.permute.xlu0 %2472  ;;  %vm2948_vm9 = vcmask 23552   ;;  %v2926_v25 = vpop.permute.xlu1 %2925 }
 0x605   : > { %3428 = dma.vmem_to_hbm [thread:$0]  (%p4197_p5), %s2992_s14, 256, %s2994_s6, %s2968_s1, %s3986_s5, %s3986_s5, %s3987_s0   ;;  %v2480_v1 = vmul.f32 %v2473_v60, %v4735_v26 }
 0x606   : > { %s4890_s16 = sld [smem:[#allocation44_spill]] }
 0x607   : > { %v2482_v5 = vsub.f32 %v4754_v45, %v2480_v1 }
 0x60a   : > { %2941 = vperm.xlu0 %3555, %v2933_v59  }
 0x60c   : > { %v2478_v63 = vpop.permute.xlu0 %2477  ;;  %s1204_s3 = scalar_lea.vmem %s4890_s16, %s4339_s2 }
 0x60d   : > { %v2481_v10 = vmul.f32 %v2478_v63, %v4727_v9 }
 0x60f   : > { %v2483_v14 = vsub.f32 %v4756_v16, %v2481_v10 }
 0x611   : > { %v2929_v28 = vmul.f32 %v2926_v25, %v2483_v14 }
 0x613   : > { %v2931_v32 = vadd.f32 %v2929_v28, %v4727_v9 }
 0x64c   : > { %v2808_v11 = vpop.permute.xlu2 %2807 }
 0x64d   : > { %v2811_v15 = vmul.f32 %v2808_v11, %v4727_v9 }
 0x64f   : > { %v2813_v30 = vsub.f32 %v4758_v50, %v2811_v15 }
 0x664   : > { %v2803_v46 = vpop.permute.xlu0 %2802 }
 0x665   : > { %v2810_v2 = vmul.f32 %v2803_v46, %v4735_v26 }
 0x667   : > { %v2812_v6 = vsub.f32 %v2702_v0, %v2810_v2 }
 0x66c   : > { %v2921_v51 = vpop.permute.xlu0 %2920 }
 0x66d   : > { %v2928_v19 = vmul.f32 %v2921_v51, %v2482_v5 }
 0x66f   : > { %v2930_v61 = vadd.f32 %v2928_v19, %v4735_v26 }
 0x674   : > { %v2937_v12 = vpop.permute.xlu0 %2936 }
 0x675   : > { %v2944_v4 = vmul.f32 %v2937_v12, %v2812_v6 }
 0x677   : > { %v2946_v20 = vadd.f32 %v2944_v4, %v2930_v61 }
 0x679   : > { %2949 = vst.msk [vmem:[%s1204_s3] sm:$0xff] %vm2948_vm9, %v2946_v20 }
 0x67c   : > { %v2942_v31 = vpop.permute.xlu0 %2941 }
 0x67d   : > { %v2945_v56 = vmul.f32 %v2942_v31, %v2813_v30 }
 0x67f   : > { %v2947_v34 = vadd.f32 %v2945_v56, %v2931_v32 }
 0x681   : > { %2950 = vst.msk [vmem:[%s1204_s3 + $0x8] sm:$0xff] %vm2948_vm9, %v2947_v34 }
 0x682 PF: > { %s4891_s8 = sld [smem:[#allocation47_spill]] }
 0x683   : > { %s4892_s7 = sld [smem:[#allocation45_spill]] }
 0x688   : > { %p3475_p5 = scmp.ge.s32.totalorder %s4891_s8, 2 }
 0x689   : > { %s3016_s2 = sand.u32 1, %s4892_s7  }
 0x68a   : > { %p3456_p4 = pnand %p3475_p5, %p4201_p6  ;;  %s3017_s4 = scalar_lea.sflag [#allocation6], %s3016_s2 }
 0x68c   : > { %p3457_p7 = pneg %p3456_p4 }
 0x68e   : > { %3925 = dma.done.wait (%p3457_p7), %s3017_s4, 256  }
 0x68f   : > { %3927 = vsyncadd (%p3457_p7), %s3017_s4, 4294967040  ;;  %s4894_s16 = sld [smem:[#allocation48_spill]]  ;;  %s4897_s10 = smov %s3934_s11 }
 0x690   : > { %s4895_s14 = sld [smem:[#allocation46_spill]] }
 0x691   : > { %s4896_s6 = sld [smem:[#allocation49_spill]] }
 0x695   : > { %p87_p8 = scmp.ge.s32.totalorder %s4894_s16, 4  }
 0x696   : > { %s4898_s11 = smov %s4895_s14 }
 0x697   : > { %s4899_s14 = smov %s4896_s6  ;;  %89 = sbr.rel (!%p87_p8) target bundleno = 67 (0x43), region = 275 }
 0x69c   :  { %3040 = vsyncpa [#allocation5], 1 }
 0x69d   :  { %3042 = vsyncpa [#allocation5 + $0x1], 1 }
 0x69e   :  { %3043 = vsyncpa [#allocation8], 1 }
 0x69f   :  { %3044 = vsyncpa [#allocation11], 1 }
 0x6a0   :  { %3045 = vsyncpa [#allocation14], 1 }
 0x6a1   :  { %3046 = vsyncpa [#allocation17], 1 }
 0x6a2   :  { %3047 = vsyncpa [#allocation6], 1 }
 0x6a3   :  { %3049 = vsyncpa [#allocation6 + $0x1], 1 }

</bundles_post_ra>
